<compile_context>
chip_gen: v6e
topology: v6e:2x2x1
jax: 0.10.0
libtpu: 0.0.40
codegen_flags: <defaults>
</compile_context>

<pallas_src>
import math

import jax
import jax.numpy as jnp
from jax.experimental import pallas as pl
from jax.experimental.pallas import tpu as pltpu

# ---------------- configuration (small synthetic BERT) ----------------
B = 2              # batch
S = 8              # sequence length
H = 32             # hidden size
NUM_HEADS = 2
HEAD_DIM = H // NUM_HEADS
INTERMEDIATE = 64
NUM_LAYERS = 2
VOCAB = 128        # lane-friendly synthetic vocab (ids drawn < 100)
TYPE_VOCAB = 2
TYPE_VOCAB_PAD = 8 # sublane-friendly padding of the type-embedding table
MAX_POS = 16
LN_EPS = 1e-12
NUM_LABELS = 2
BS = B * S

VMEM_SPEC = pl.BlockSpec(memory_space=pltpu.MemorySpace.VMEM)


def _layer_norm(x, g, b):
    mu = jnp.mean(x, axis=-1, keepdims=True)
    var = jnp.mean(jnp.square(x - mu), axis=-1, keepdims=True)
    return (x - mu) * jax.lax.rsqrt(var + LN_EPS) * g + b


def _mm(a, w):
    # bf16 operands to the MXU, f32 accumulation.
    return jnp.dot(a.astype(jnp.bfloat16), w, preferred_element_type=jnp.float32)


# ---------------- single fused Pallas kernel: embeddings + encoder + head ----------------
def bert_fused_kernel(ids_ref, seg_ref, maskb_ref,
                      wemb_ref, temb_ref, pos_ref, elng_ref, elnb_ref,
                      wqkv_ref, bqkv_ref, wo_ref, bo_ref, ln1g_ref, ln1b_ref,
                      w1_ref, b1_ref, w2_ref, b2_ref, ln2g_ref, ln2b_ref,
                      wp_ref, bp_ref, wf_ref, bf_ref,
                      out_ref):
    # ---- embeddings: one-hot @ table keeps the gathers on the MXU ----
    ids = ids_ref[...]                                               # [BS, 1] int32
    seg = seg_ref[...]                                               # [BS, 1] int32
    word_oh = (jax.lax.broadcasted_iota(jnp.int32, (BS, VOCAB), 1) == ids
               ).astype(jnp.bfloat16)
    type_oh = (jax.lax.broadcasted_iota(jnp.int32, (BS, TYPE_VOCAB_PAD), 1) == seg
               ).astype(jnp.bfloat16)
    x = (jnp.dot(word_oh, wemb_ref[...], preferred_element_type=jnp.float32)
         + jnp.dot(type_oh, temb_ref[...], preferred_element_type=jnp.float32)
         + pos_ref[...])
    x = _layer_norm(x, elng_ref[...], elnb_ref[...])                 # [BS, H] f32

    # additive attention-mask bias, broadcast once (hoisted out of all loops)
    mask_full = jnp.broadcast_to(maskb_ref[...], (B, S, S))

    for l in range(NUM_LAYERS):                                      # static unroll (2 layers)
        # fused QKV projection: single [BS, H] x [H, 3H] MXU pass
        qkv = _mm(x, wqkv_ref[l]) + bqkv_ref[l]                      # [BS, 3H] f32
        q = qkv[:, 0 * H:1 * H].reshape(B, S, H)
        k = qkv[:, 1 * H:2 * H].reshape(B, S, H)
        v = qkv[:, 2 * H:3 * H].reshape(B, S, H)

        ctx_heads = []
        for h in range(NUM_HEADS):                                   # static unroll (2 heads)
            sl = slice(h * HEAD_DIM, (h + 1) * HEAD_DIM)
            # 1/sqrt(head_dim) is pre-folded into the Q weights/bias
            scores = jnp.einsum('bqd,bkd->bqk',
                                q[..., sl].astype(jnp.bfloat16),
                                k[..., sl].astype(jnp.bfloat16),
                                preferred_element_type=jnp.float32)
            scores = scores + mask_full
            scores = scores - jnp.max(scores, axis=-1, keepdims=True)
            p = jnp.exp(scores)
            p = p * pl.reciprocal(jnp.sum(p, axis=-1, keepdims=True), approx=True)
            ctx = jnp.einsum('bqk,bkd->bqd',
                             p.astype(jnp.bfloat16),
                             v[..., sl].astype(jnp.bfloat16),
                             preferred_element_type=jnp.float32)
            ctx_heads.append(ctx.reshape(BS, HEAD_DIM))
        ctx = jnp.concatenate(ctx_heads, axis=-1)                    # [BS, H]

        attn = _mm(ctx, wo_ref[l]) + bo_ref[l]                       # one concatenated Wo matmul
        h1 = _layer_norm(x + attn, ln1g_ref[l], ln1b_ref[l])

        ff = _mm(h1, w1_ref[l]) + b1_ref[l]
        # TODO(synk): HF BERT default is the exact erf GELU; tanh approximation used here.
        ff = jax.nn.gelu(ff, approximate=True)
        ff = _mm(ff, w2_ref[l]) + b2_ref[l]
        x = _layer_norm(h1 + ff, ln2g_ref[l], ln2b_ref[l])

    # ---- classification head on the still-VMEM-resident final activations ----
    # CLS rows are rows b*S of the flattened activations; pick them with a one-hot matmul
    sel = (jax.lax.broadcasted_iota(jnp.int32, (B, BS), 1)
           == jax.lax.broadcasted_iota(jnp.int32, (B, BS), 0) * S).astype(jnp.bfloat16)
    cls = jnp.dot(sel, x.astype(jnp.bfloat16),
                  preferred_element_type=jnp.float32)                # [B, H]
    hcls = _mm(cls, wp_ref[...]) + bp_ref[...]                       # cls_prj
    # cls_dropout: eval-mode dropout == identity
    out_ref[...] = _mm(hcls, wf_ref[...]) + bf_ref[...]              # cls_final -> [B, 2]


# ---------------- deterministic parameter init (natural per-layer layout) ----------------
def init_params(key):
    def nrm(k, shape, scale=0.02):
        return scale * jax.random.normal(k, shape, dtype=jnp.float32)

    keys = iter(jax.random.split(key, 8 * NUM_LAYERS + 16))
    params = {
        'word_emb': nrm(next(keys), (VOCAB, H)),
        'pos_emb': nrm(next(keys), (MAX_POS, H)),
        'type_emb': nrm(next(keys), (TYPE_VOCAB_PAD, H)),  # only rows [0, TYPE_VOCAB) used
        'emb_ln_g': jnp.ones((1, H), jnp.float32),
        'emb_ln_b': jnp.zeros((1, H), jnp.float32),
        'cls_prj_w': nrm(next(keys), (H, H)),
        'cls_prj_b': jnp.zeros((1, H), jnp.float32),
        'cls_final_w': nrm(next(keys), (H, NUM_LABELS)),
        'cls_final_b': jnp.zeros((1, NUM_LABELS), jnp.float32),
        'layers': [],
    }
    for _ in range(NUM_LAYERS):
        layer = {
            'wq': nrm(next(keys), (H, H)), 'bq': jnp.zeros((1, H), jnp.float32),
            'wk': nrm(next(keys), (H, H)), 'bk': jnp.zeros((1, H), jnp.float32),
            'wv': nrm(next(keys), (H, H)), 'bv': jnp.zeros((1, H), jnp.float32),
            'wo': nrm(next(keys), (H, H)), 'bo': jnp.zeros((1, H), jnp.float32),
            'ln1_g': jnp.ones((1, H), jnp.float32), 'ln1_b': jnp.zeros((1, H), jnp.float32),
            'w1': nrm(next(keys), (H, INTERMEDIATE)),
            'b1': jnp.zeros((1, INTERMEDIATE), jnp.float32),
            'w2': nrm(next(keys), (INTERMEDIATE, H)),
            'b2': jnp.zeros((1, H), jnp.float32),
            'ln2_g': jnp.ones((1, H), jnp.float32), 'ln2_b': jnp.zeros((1, H), jnp.float32),
        }
        params['layers'].append(layer)
    return params


# ---------------- inference-time parameter prep: fuse QKV, fold scale, stack, bf16 ----------------
def prepare_inference_params(params):
    scale = 1.0 / math.sqrt(HEAD_DIM)
    ls = params['layers']

    def stack(f):
        return jnp.stack([f(lp) for lp in ls])

    return {
        'wemb': params['word_emb'].astype(jnp.bfloat16),
        'temb': params['type_emb'].astype(jnp.bfloat16),
        'pos_flat': jnp.tile(params['pos_emb'][:S], (B, 1)),        # [BS, H] f32
        'eln_g': params['emb_ln_g'], 'eln_b': params['emb_ln_b'],
        'wqkv': stack(lambda lp: jnp.concatenate(
            [lp['wq'] * scale, lp['wk'], lp['wv']], axis=1)).astype(jnp.bfloat16),
        'bqkv': stack(lambda lp: jnp.concatenate(
            [lp['bq'] * scale, lp['bk'], lp['bv']], axis=1)),
        'wo': stack(lambda lp: lp['wo']).astype(jnp.bfloat16),
        'bo': stack(lambda lp: lp['bo']),
        'ln1g': stack(lambda lp: lp['ln1_g']), 'ln1b': stack(lambda lp: lp['ln1_b']),
        'w1': stack(lambda lp: lp['w1']).astype(jnp.bfloat16),
        'b1': stack(lambda lp: lp['b1']),
        'w2': stack(lambda lp: lp['w2']).astype(jnp.bfloat16),
        'b2': stack(lambda lp: lp['b2']),
        'ln2g': stack(lambda lp: lp['ln2_g']), 'ln2b': stack(lambda lp: lp['ln2_b']),
        'wp': params['cls_prj_w'].astype(jnp.bfloat16), 'bp': params['cls_prj_b'],
        'wf': params['cls_final_w'].astype(jnp.bfloat16), 'bf': params['cls_final_b'],
    }


# ---------------- full forward (Bert_model.forward semantics), one pallas_call ----------------
@jax.jit
def bert_model_forward(ip, input_ids, input_mask, segment_ids):
    ids_flat = input_ids.reshape(BS, 1).astype(jnp.int32)
    seg_flat = segment_ids.reshape(BS, 1).astype(jnp.int32)
    maskb = (1.0 - input_mask.astype(jnp.float32))[:, None, :] * (-1e4)  # [B, 1, S]

    args = (ids_flat, seg_flat, maskb,
            ip['wemb'], ip['temb'], ip['pos_flat'], ip['eln_g'], ip['eln_b'],
            ip['wqkv'], ip['bqkv'], ip['wo'], ip['bo'], ip['ln1g'], ip['ln1b'],
            ip['w1'], ip['b1'], ip['w2'], ip['b2'], ip['ln2g'], ip['ln2b'],
            ip['wp'], ip['bp'], ip['wf'], ip['bf'])

    # Whole model (~50 KB bf16 weights + ~10 KB activations) fits trivially in VMEM on
    # v5e/v6e/v7x, so no grid / tiling is needed.  For v7x at larger batch, add a
    # grid=(B,) axis with dimension_semantics=("parallel",) to use both TensorCores.
    return pl.pallas_call(
        bert_fused_kernel,
        out_shape=jax.ShapeDtypeStruct((B, NUM_LABELS), jnp.float32),
        in_specs=[VMEM_SPEC] * len(args),
        out_specs=VMEM_SPEC,
    )(*args)


if __name__ == "__main__":
    key = jax.random.PRNGKey(0)
    k_param, k_ids, k_seg = jax.random.split(key, 3)

    params = init_params(k_param)
    infer_params = prepare_inference_params(params)

    input_ids = jax.random.randint(k_ids, (B, S), 0, 100, dtype=jnp.int32)
    # mask out the last two positions of the second example
    input_mask = jnp.array([[1] * S, [1] * (S - 2) + [0, 0]], dtype=jnp.int32)
    segment_ids = jax.random.randint(k_seg, (B, S), 0, TYPE_VOCAB, dtype=jnp.int32)

    logits = bert_model_forward(infer_params, input_ids, input_mask, segment_ids)
    logits = jax.block_until_ready(logits)
    assert logits.shape == (B, NUM_LABELS) and logits.dtype == jnp.float32
    # TODO(synk): pretrained BERT checkpoint weights are not loadable here; encoder uses synthetic init.
    print("KERNEL_OK")
</pallas_src>

<mosaic_0001>
module attributes {stable_mosaic.version = 11 : i64} {
  func.func @bert_fused_kernel(%arg0: memref<16x1xi32, #tpu.memory_space<vmem>>, %arg1: memref<16x1xi32, #tpu.memory_space<vmem>>, %arg2: memref<2x1x8xf32, #tpu.memory_space<vmem>>, %arg3: memref<128x32xbf16, #tpu.memory_space<vmem>>, %arg4: memref<8x32xbf16, #tpu.memory_space<vmem>>, %arg5: memref<16x32xf32, #tpu.memory_space<vmem>>, %arg6: memref<1x32xf32, #tpu.memory_space<vmem>>, %arg7: memref<1x32xf32, #tpu.memory_space<vmem>>, %arg8: memref<2x32x96xbf16, #tpu.memory_space<vmem>>, %arg9: memref<2x1x96xf32, #tpu.memory_space<vmem>>, %arg10: memref<2x32x32xbf16, #tpu.memory_space<vmem>>, %arg11: memref<2x1x32xf32, #tpu.memory_space<vmem>>, %arg12: memref<2x1x32xf32, #tpu.memory_space<vmem>>, %arg13: memref<2x1x32xf32, #tpu.memory_space<vmem>>, %arg14: memref<2x32x64xbf16, #tpu.memory_space<vmem>>, %arg15: memref<2x1x64xf32, #tpu.memory_space<vmem>>, %arg16: memref<2x64x32xbf16, #tpu.memory_space<vmem>>, %arg17: memref<2x1x32xf32, #tpu.memory_space<vmem>>, %arg18: memref<2x1x32xf32, #tpu.memory_space<vmem>>, %arg19: memref<2x1x32xf32, #tpu.memory_space<vmem>>, %arg20: memref<32x32xbf16, #tpu.memory_space<vmem>>, %arg21: memref<1x32xf32, #tpu.memory_space<vmem>>, %arg22: memref<32x2xbf16, #tpu.memory_space<vmem>>, %arg23: memref<1x2xf32, #tpu.memory_space<vmem>>, %arg24: memref<2x2xf32, #tpu.memory_space<vmem>>) attributes {dimension_semantics = [], scalar_prefetch = 0 : i64, scratch_operands = 0 : i64, tpu.core_type = #tpu.core_type<tc>} {
    %c0 = arith.constant 0 : index
    %c0_0 = arith.constant 0 : index
    %0 = vector.load %arg0[%c0, %c0_0] : memref<16x1xi32, #tpu.memory_space<vmem>>, vector<16x1xi32>
    %c0_1 = arith.constant 0 : index
    %c0_2 = arith.constant 0 : index
    %1 = vector.load %arg1[%c0_1, %c0_2] : memref<16x1xi32, #tpu.memory_space<vmem>>, vector<16x1xi32>
    %2 = tpu.iota {dimensions = array<i32: 1>} : vector<16x128xi32>
    %3 = vector.broadcast %0 : vector<16x1xi32> to vector<16x128xi32>
    %4 = arith.cmpi eq, %2, %3 : vector<16x128xi32>
    %5 = arith.extui %4 : vector<16x128xi1> to vector<16x128xi32>
    %6 = arith.sitofp %5 : vector<16x128xi32> to vector<16x128xf32>
    %7 = arith.truncf %6 : vector<16x128xf32> to vector<16x128xbf16>
    %8 = tpu.iota {dimensions = array<i32: 1>} : vector<16x8xi32>
    %9 = vector.broadcast %1 : vector<16x1xi32> to vector<16x8xi32>
    %10 = arith.cmpi eq, %8, %9 : vector<16x8xi32>
    %11 = arith.extui %10 : vector<16x8xi1> to vector<16x8xi32>
    %12 = arith.sitofp %11 : vector<16x8xi32> to vector<16x8xf32>
    %13 = arith.truncf %12 : vector<16x8xf32> to vector<16x8xbf16>
    %c0_3 = arith.constant 0 : index
    %c0_4 = arith.constant 0 : index
    %14 = vector.load %arg3[%c0_3, %c0_4] : memref<128x32xbf16, #tpu.memory_space<vmem>>, vector<128x32xbf16>
    %cst = arith.constant dense<0.000000e+00> : vector<16x32xf32>
    %15 = tpu.matmul %7, %14, %cst {dimension_numbers = #tpu.dot_dimension_numbers<[1], [0], [0], [1], [0, 0, 1, 1], [], []>} : vector<16x128xbf16>, vector<128x32xbf16>, vector<16x32xf32> -> vector<16x32xf32>
    %c0_5 = arith.constant 0 : index
    %c0_6 = arith.constant 0 : index
    %16 = vector.load %arg4[%c0_5, %c0_6] : memref<8x32xbf16, #tpu.memory_space<vmem>>, vector<8x32xbf16>
    %cst_7 = arith.constant dense<0.000000e+00> : vector<16x32xf32>
    %17 = tpu.matmul %13, %16, %cst_7 {dimension_numbers = #tpu.dot_dimension_numbers<[1], [0], [0], [1], [0, 0, 1, 1], [], []>} : vector<16x8xbf16>, vector<8x32xbf16>, vector<16x32xf32> -> vector<16x32xf32>
    %18 = arith.addf %15, %17 : vector<16x32xf32>
    %c0_8 = arith.constant 0 : index
    %c0_9 = arith.constant 0 : index
    %19 = vector.load %arg5[%c0_8, %c0_9] : memref<16x32xf32, #tpu.memory_space<vmem>>, vector<16x32xf32>
    %20 = arith.addf %18, %19 : vector<16x32xf32>
    %c0_10 = arith.constant 0 : index
    %c0_11 = arith.constant 0 : index
    %21 = vector.load %arg6[%c0_10, %c0_11] : memref<1x32xf32, #tpu.memory_space<vmem>>, vector<1x32xf32>
    %c0_12 = arith.constant 0 : index
    %c0_13 = arith.constant 0 : index
    %22 = vector.load %arg7[%c0_12, %c0_13] : memref<1x32xf32, #tpu.memory_space<vmem>>, vector<1x32xf32>
    %cst_14 = arith.constant dense<0.000000e+00> : vector<16xf32>
    %23 = vector.multi_reduction <add>, %20, %cst_14 [1] : vector<16x32xf32> to vector<16xf32>
    %24 = vector.shape_cast %23 : vector<16xf32> to vector<16x1xf32>
    %cst_15 = arith.constant 3.200000e+01 : f32
    %25 = vector.broadcast %cst_15 : f32 to vector<16x1xf32>
    %26 = arith.divf %24, %25 : vector<16x1xf32>
    %27 = vector.broadcast %26 : vector<16x1xf32> to vector<16x32xf32>
    %28 = arith.subf %20, %27 : vector<16x32xf32>
    %29 = arith.mulf %28, %28 : vector<16x32xf32>
    %cst_16 = arith.constant dense<0.000000e+00> : vector<16xf32>
    %30 = vector.multi_reduction <add>, %29, %cst_16 [1] : vector<16x32xf32> to vector<16xf32>
    %31 = vector.shape_cast %30 : vector<16xf32> to vector<16x1xf32>
    %cst_17 = arith.constant 3.200000e+01 : f32
    %32 = vector.broadcast %cst_17 : f32 to vector<16x1xf32>
    %33 = arith.divf %31, %32 : vector<16x1xf32>
    %34 = vector.broadcast %26 : vector<16x1xf32> to vector<16x32xf32>
    %35 = arith.subf %20, %34 : vector<16x32xf32>
    %cst_18 = arith.constant 9.99999996E-13 : f32
    %36 = vector.broadcast %cst_18 : f32 to vector<16x1xf32>
    %37 = arith.addf %33, %36 : vector<16x1xf32>
    %38 = math.rsqrt %37 : vector<16x1xf32>
    %39 = vector.broadcast %38 : vector<16x1xf32> to vector<16x32xf32>
    %40 = arith.mulf %35, %39 : vector<16x32xf32>
    %41 = vector.broadcast %21 : vector<1x32xf32> to vector<16x32xf32>
    %42 = arith.mulf %40, %41 : vector<16x32xf32>
    %43 = vector.broadcast %22 : vector<1x32xf32> to vector<16x32xf32>
    %44 = arith.addf %42, %43 : vector<16x32xf32>
    %c0_19 = arith.constant 0 : index
    %c0_20 = arith.constant 0 : index
    %c0_21 = arith.constant 0 : index
    %45 = vector.load %arg2[%c0_19, %c0_20, %c0_21] : memref<2x1x8xf32, #tpu.memory_space<vmem>>, vector<2x1x8xf32>
    %46 = vector.shape_cast %45 : vector<2x1x8xf32> to vector<2x1x8xf32>
    %47 = vector.broadcast %46 : vector<2x1x8xf32> to vector<2x8x8xf32>
    %c0_22 = arith.constant 0 : index
    %c0_23 = arith.constant 0 : index
    %c0_24 = arith.constant 0 : index
    %48 = vector.load %arg8[%c0_22, %c0_23, %c0_24] : memref<2x32x96xbf16, #tpu.memory_space<vmem>>, vector<1x32x96xbf16>
    %49 = vector.shape_cast %48 : vector<1x32x96xbf16> to vector<32x96xbf16>
    %50 = arith.truncf %44 : vector<16x32xf32> to vector<16x32xbf16>
    %cst_25 = arith.constant dense<0.000000e+00> : vector<16x96xf32>
    %51 = tpu.matmul %50, %49, %cst_25 {dimension_numbers = #tpu.dot_dimension_numbers<[1], [0], [0], [1], [0, 0, 1, 1], [], []>} : vector<16x32xbf16>, vector<32x96xbf16>, vector<16x96xf32> -> vector<16x96xf32>
    %c0_26 = arith.constant 0 : index
    %c0_27 = arith.constant 0 : index
    %c0_28 = arith.constant 0 : index
    %52 = vector.load %arg9[%c0_26, %c0_27, %c0_28] : memref<2x1x96xf32, #tpu.memory_space<vmem>>, vector<1x1x96xf32>
    %53 = vector.shape_cast %52 : vector<1x1x96xf32> to vector<1x96xf32>
    %54 = vector.broadcast %53 : vector<1x96xf32> to vector<16x96xf32>
    %55 = arith.addf %51, %54 : vector<16x96xf32>
    %56 = vector.extract_strided_slice %55 {offsets = [0, 0], sizes = [16, 32], strides = [1, 1]} : vector<16x96xf32> to vector<16x32xf32>
    %57 = vector.shape_cast %56 : vector<16x32xf32> to vector<2x8x32xf32>
    %58 = vector.extract_strided_slice %55 {offsets = [0, 32], sizes = [16, 32], strides = [1, 1]} : vector<16x96xf32> to vector<16x32xf32>
    %59 = vector.shape_cast %58 : vector<16x32xf32> to vector<2x8x32xf32>
    %60 = vector.extract_strided_slice %55 {offsets = [0, 64], sizes = [16, 32], strides = [1, 1]} : vector<16x96xf32> to vector<16x32xf32>
    %61 = vector.shape_cast %60 : vector<16x32xf32> to vector<2x8x32xf32>
    %62 = vector.extract_strided_slice %57 {offsets = [0, 0, 0], sizes = [2, 8, 16], strides = [1, 1, 1]} : vector<2x8x32xf32> to vector<2x8x16xf32>
    %63 = arith.truncf %62 : vector<2x8x16xf32> to vector<2x8x16xbf16>
    %64 = vector.extract_strided_slice %59 {offsets = [0, 0, 0], sizes = [2, 8, 16], strides = [1, 1, 1]} : vector<2x8x32xf32> to vector<2x8x16xf32>
    %65 = arith.truncf %64 : vector<2x8x16xf32> to vector<2x8x16xbf16>
    "tpu.trace_start"() <{level = 10 : i32, message = "bqd,bkd->bqk"}> : () -> ()
    %cst_29 = arith.constant dense<0.000000e+00> : vector<2x8x8xf32>
    %66 = tpu.matmul %63, %65, %cst_29 {dimension_numbers = #tpu.dot_dimension_numbers<[2], [2], [1], [1], [0, 0, 0, 1, 1, 1], [0], [0]>} : vector<2x8x16xbf16>, vector<2x8x16xbf16>, vector<2x8x8xf32> -> vector<2x8x8xf32>
    "tpu.trace_stop"() : () -> ()
    %67 = arith.addf %66, %47 : vector<2x8x8xf32>
    %cst_30 = arith.constant dense<0xFF800000> : vector<2x8xf32>
    %68 = vector.multi_reduction <maximumf>, %67, %cst_30 [2] : vector<2x8x8xf32> to vector<2x8xf32>
    %69 = vector.shape_cast %68 : vector<2x8xf32> to vector<2x8x1xf32>
    %70 = vector.broadcast %69 : vector<2x8x1xf32> to vector<2x8x8xf32>
    %71 = arith.subf %67, %70 : vector<2x8x8xf32>
    %72 = math.exp %71 : vector<2x8x8xf32>
    %cst_31 = arith.constant dense<0.000000e+00> : vector<2x8xf32>
    %73 = vector.multi_reduction <add>, %72, %cst_31 [2] : vector<2x8x8xf32> to vector<2x8xf32>
    %74 = vector.shape_cast %73 : vector<2x8xf32> to vector<2x8x1xf32>
    %75 = tpu.reciprocal %74 {approx = true} : vector<2x8x1xf32> -> vector<2x8x1xf32>
    %76 = vector.broadcast %75 : vector<2x8x1xf32> to vector<2x8x8xf32>
    %77 = arith.mulf %72, %76 : vector<2x8x8xf32>
    %78 = arith.truncf %77 : vector<2x8x8xf32> to vector<2x8x8xbf16>
    %79 = vector.extract_strided_slice %61 {offsets = [0, 0, 0], sizes = [2, 8, 16], strides = [1, 1, 1]} : vector<2x8x32xf32> to vector<2x8x16xf32>
    %80 = arith.truncf %79 : vector<2x8x16xf32> to vector<2x8x16xbf16>
    "tpu.trace_start"() <{level = 10 : i32, message = "bqk,bkd->bqd"}> : () -> ()
    %cst_32 = arith.constant dense<0.000000e+00> : vector<2x8x16xf32>
    %81 = tpu.matmul %78, %80, %cst_32 {dimension_numbers = #tpu.dot_dimension_numbers<[2], [1], [1], [2], [0, 0, 0, 1, 1, 2], [0], [0]>} : vector<2x8x8xbf16>, vector<2x8x16xbf16>, vector<2x8x16xf32> -> vector<2x8x16xf32>
    "tpu.trace_stop"() : () -> ()
    %82 = vector.shape_cast %81 : vector<2x8x16xf32> to vector<16x16xf32>
    %83 = vector.extract_strided_slice %57 {offsets = [0, 0, 16], sizes = [2, 8, 16], strides = [1, 1, 1]} : vector<2x8x32xf32> to vector<2x8x16xf32>
    %84 = arith.truncf %83 : vector<2x8x16xf32> to vector<2x8x16xbf16>
    %85 = vector.extract_strided_slice %59 {offsets = [0, 0, 16], sizes = [2, 8, 16], strides = [1, 1, 1]} : vector<2x8x32xf32> to vector<2x8x16xf32>
    %86 = arith.truncf %85 : vector<2x8x16xf32> to vector<2x8x16xbf16>
    "tpu.trace_start"() <{level = 10 : i32, message = "bqd,bkd->bqk"}> : () -> ()
    %cst_33 = arith.constant dense<0.000000e+00> : vector<2x8x8xf32>
    %87 = tpu.matmul %84, %86, %cst_33 {dimension_numbers = #tpu.dot_dimension_numbers<[2], [2], [1], [1], [0, 0, 0, 1, 1, 1], [0], [0]>} : vector<2x8x16xbf16>, vector<2x8x16xbf16>, vector<2x8x8xf32> -> vector<2x8x8xf32>
    "tpu.trace_stop"() : () -> ()
    %88 = arith.addf %87, %47 : vector<2x8x8xf32>
    %cst_34 = arith.constant dense<0xFF800000> : vector<2x8xf32>
    %89 = vector.multi_reduction <maximumf>, %88, %cst_34 [2] : vector<2x8x8xf32> to vector<2x8xf32>
    %90 = vector.shape_cast %89 : vector<2x8xf32> to vector<2x8x1xf32>
    %91 = vector.broadcast %90 : vector<2x8x1xf32> to vector<2x8x8xf32>
    %92 = arith.subf %88, %91 : vector<2x8x8xf32>
    %93 = math.exp %92 : vector<2x8x8xf32>
    %cst_35 = arith.constant dense<0.000000e+00> : vector<2x8xf32>
    %94 = vector.multi_reduction <add>, %93, %cst_35 [2] : vector<2x8x8xf32> to vector<2x8xf32>
    %95 = vector.shape_cast %94 : vector<2x8xf32> to vector<2x8x1xf32>
    %96 = tpu.reciprocal %95 {approx = true} : vector<2x8x1xf32> -> vector<2x8x1xf32>
    %97 = vector.broadcast %96 : vector<2x8x1xf32> to vector<2x8x8xf32>
    %98 = arith.mulf %93, %97 : vector<2x8x8xf32>
    %99 = arith.truncf %98 : vector<2x8x8xf32> to vector<2x8x8xbf16>
    %100 = vector.extract_strided_slice %61 {offsets = [0, 0, 16], sizes = [2, 8, 16], strides = [1, 1, 1]} : vector<2x8x32xf32> to vector<2x8x16xf32>
    %101 = arith.truncf %100 : vector<2x8x16xf32> to vector<2x8x16xbf16>
    "tpu.trace_start"() <{level = 10 : i32, message = "bqk,bkd->bqd"}> : () -> ()
    %cst_36 = arith.constant dense<0.000000e+00> : vector<2x8x16xf32>
    %102 = tpu.matmul %99, %101, %cst_36 {dimension_numbers = #tpu.dot_dimension_numbers<[2], [1], [1], [2], [0, 0, 0, 1, 1, 2], [0], [0]>} : vector<2x8x8xbf16>, vector<2x8x16xbf16>, vector<2x8x16xf32> -> vector<2x8x16xf32>
    "tpu.trace_stop"() : () -> ()
    %103 = vector.shape_cast %102 : vector<2x8x16xf32> to vector<16x16xf32>
    %104 = tpu.concatenate %82, %103 in 1 : vector<16x16xf32>, vector<16x16xf32> -> vector<16x32xf32>
    %c0_37 = arith.constant 0 : index
    %c0_38 = arith.constant 0 : index
    %c0_39 = arith.constant 0 : index
    %105 = vector.load %arg10[%c0_37, %c0_38, %c0_39] : memref<2x32x32xbf16, #tpu.memory_space<vmem>>, vector<1x32x32xbf16>
    %106 = vector.shape_cast %105 : vector<1x32x32xbf16> to vector<32x32xbf16>
    %107 = arith.truncf %104 : vector<16x32xf32> to vector<16x32xbf16>
    %cst_40 = arith.constant dense<0.000000e+00> : vector<16x32xf32>
    %108 = tpu.matmul %107, %106, %cst_40 {dimension_numbers = #tpu.dot_dimension_numbers<[1], [0], [0], [1], [0, 0, 1, 1], [], []>} : vector<16x32xbf16>, vector<32x32xbf16>, vector<16x32xf32> -> vector<16x32xf32>
    %c0_41 = arith.constant 0 : index
    %c0_42 = arith.constant 0 : index
    %c0_43 = arith.constant 0 : index
    %109 = vector.load %arg11[%c0_41, %c0_42, %c0_43] : memref<2x1x32xf32, #tpu.memory_space<vmem>>, vector<1x1x32xf32>
    %110 = vector.shape_cast %109 : vector<1x1x32xf32> to vector<1x32xf32>
    %111 = vector.broadcast %110 : vector<1x32xf32> to vector<16x32xf32>
    %112 = arith.addf %108, %111 : vector<16x32xf32>
    %113 = arith.addf %44, %112 : vector<16x32xf32>
    %c0_44 = arith.constant 0 : index
    %c0_45 = arith.constant 0 : index
    %c0_46 = arith.constant 0 : index
    %114 = vector.load %arg12[%c0_44, %c0_45, %c0_46] : memref<2x1x32xf32, #tpu.memory_space<vmem>>, vector<1x1x32xf32>
    %115 = vector.shape_cast %114 : vector<1x1x32xf32> to vector<1x32xf32>
    %c0_47 = arith.constant 0 : index
    %c0_48 = arith.constant 0 : index
    %c0_49 = arith.constant 0 : index
    %116 = vector.load %arg13[%c0_47, %c0_48, %c0_49] : memref<2x1x32xf32, #tpu.memory_space<vmem>>, vector<1x1x32xf32>
    %117 = vector.shape_cast %116 : vector<1x1x32xf32> to vector<1x32xf32>
    %cst_50 = arith.constant dense<0.000000e+00> : vector<16xf32>
    %118 = vector.multi_reduction <add>, %113, %cst_50 [1] : vector<16x32xf32> to vector<16xf32>
    %119 = vector.shape_cast %118 : vector<16xf32> to vector<16x1xf32>
    %cst_51 = arith.constant 3.200000e+01 : f32
    %120 = vector.broadcast %cst_51 : f32 to vector<16x1xf32>
    %121 = arith.divf %119, %120 : vector<16x1xf32>
    %122 = vector.broadcast %121 : vector<16x1xf32> to vector<16x32xf32>
    %123 = arith.subf %113, %122 : vector<16x32xf32>
    %124 = arith.mulf %123, %123 : vector<16x32xf32>
    %cst_52 = arith.constant dense<0.000000e+00> : vector<16xf32>
    %125 = vector.multi_reduction <add>, %124, %cst_52 [1] : vector<16x32xf32> to vector<16xf32>
    %126 = vector.shape_cast %125 : vector<16xf32> to vector<16x1xf32>
    %cst_53 = arith.constant 3.200000e+01 : f32
    %127 = vector.broadcast %cst_53 : f32 to vector<16x1xf32>
    %128 = arith.divf %126, %127 : vector<16x1xf32>
    %129 = vector.broadcast %121 : vector<16x1xf32> to vector<16x32xf32>
    %130 = arith.subf %113, %129 : vector<16x32xf32>
    %cst_54 = arith.constant 9.99999996E-13 : f32
    %131 = vector.broadcast %cst_54 : f32 to vector<16x1xf32>
    %132 = arith.addf %128, %131 : vector<16x1xf32>
    %133 = math.rsqrt %132 : vector<16x1xf32>
    %134 = vector.broadcast %133 : vector<16x1xf32> to vector<16x32xf32>
    %135 = arith.mulf %130, %134 : vector<16x32xf32>
    %136 = vector.broadcast %115 : vector<1x32xf32> to vector<16x32xf32>
    %137 = arith.mulf %135, %136 : vector<16x32xf32>
    %138 = vector.broadcast %117 : vector<1x32xf32> to vector<16x32xf32>
    %139 = arith.addf %137, %138 : vector<16x32xf32>
    %c0_55 = arith.constant 0 : index
    %c0_56 = arith.constant 0 : index
    %c0_57 = arith.constant 0 : index
    %140 = vector.load %arg14[%c0_55, %c0_56, %c0_57] : memref<2x32x64xbf16, #tpu.memory_space<vmem>>, vector<1x32x64xbf16>
    %141 = vector.shape_cast %140 : vector<1x32x64xbf16> to vector<32x64xbf16>
    %142 = arith.truncf %139 : vector<16x32xf32> to vector<16x32xbf16>
    %cst_58 = arith.constant dense<0.000000e+00> : vector<16x64xf32>
    %143 = tpu.matmul %142, %141, %cst_58 {dimension_numbers = #tpu.dot_dimension_numbers<[1], [0], [0], [1], [0, 0, 1, 1], [], []>} : vector<16x32xbf16>, vector<32x64xbf16>, vector<16x64xf32> -> vector<16x64xf32>
    %c0_59 = arith.constant 0 : index
    %c0_60 = arith.constant 0 : index
    %c0_61 = arith.constant 0 : index
    %144 = vector.load %arg15[%c0_59, %c0_60, %c0_61] : memref<2x1x64xf32, #tpu.memory_space<vmem>>, vector<1x1x64xf32>
    %145 = vector.shape_cast %144 : vector<1x1x64xf32> to vector<1x64xf32>
    %146 = vector.broadcast %145 : vector<1x64xf32> to vector<16x64xf32>
    %147 = arith.addf %143, %146 : vector<16x64xf32>
    %148 = arith.mulf %147, %147 : vector<16x64xf32>
    %149 = arith.mulf %147, %148 : vector<16x64xf32>
    %cst_62 = arith.constant 4.471500e-02 : f32
    %150 = vector.broadcast %cst_62 : f32 to vector<16x64xf32>
    %151 = arith.mulf %150, %149 : vector<16x64xf32>
    %152 = arith.addf %147, %151 : vector<16x64xf32>
    %cst_63 = arith.constant 0.797884583 : f32
    %153 = vector.broadcast %cst_63 : f32 to vector<16x64xf32>
    %154 = arith.mulf %153, %152 : vector<16x64xf32>
    %155 = math.tanh %154 : vector<16x64xf32>
    %cst_64 = arith.constant 1.000000e+00 : f32
    %156 = vector.broadcast %cst_64 : f32 to vector<16x64xf32>
    %157 = arith.addf %156, %155 : vector<16x64xf32>
    %cst_65 = arith.constant 5.000000e-01 : f32
    %158 = vector.broadcast %cst_65 : f32 to vector<16x64xf32>
    %159 = arith.mulf %158, %157 : vector<16x64xf32>
    %160 = arith.mulf %147, %159 : vector<16x64xf32>
    %c0_66 = arith.constant 0 : index
    %c0_67 = arith.constant 0 : index
    %c0_68 = arith.constant 0 : index
    %161 = vector.load %arg16[%c0_66, %c0_67, %c0_68] : memref<2x64x32xbf16, #tpu.memory_space<vmem>>, vector<1x64x32xbf16>
    %162 = vector.shape_cast %161 : vector<1x64x32xbf16> to vector<64x32xbf16>
    %163 = arith.truncf %160 : vector<16x64xf32> to vector<16x64xbf16>
    %cst_69 = arith.constant dense<0.000000e+00> : vector<16x32xf32>
    %164 = tpu.matmul %163, %162, %cst_69 {dimension_numbers = #tpu.dot_dimension_numbers<[1], [0], [0], [1], [0, 0, 1, 1], [], []>} : vector<16x64xbf16>, vector<64x32xbf16>, vector<16x32xf32> -> vector<16x32xf32>
    %c0_70 = arith.constant 0 : index
    %c0_71 = arith.constant 0 : index
    %c0_72 = arith.constant 0 : index
    %165 = vector.load %arg17[%c0_70, %c0_71, %c0_72] : memref<2x1x32xf32, #tpu.memory_space<vmem>>, vector<1x1x32xf32>
    %166 = vector.shape_cast %165 : vector<1x1x32xf32> to vector<1x32xf32>
    %167 = vector.broadcast %166 : vector<1x32xf32> to vector<16x32xf32>
    %168 = arith.addf %164, %167 : vector<16x32xf32>
    %169 = arith.addf %139, %168 : vector<16x32xf32>
    %c0_73 = arith.constant 0 : index
    %c0_74 = arith.constant 0 : index
    %c0_75 = arith.constant 0 : index
    %170 = vector.load %arg18[%c0_73, %c0_74, %c0_75] : memref<2x1x32xf32, #tpu.memory_space<vmem>>, vector<1x1x32xf32>
    %171 = vector.shape_cast %170 : vector<1x1x32xf32> to vector<1x32xf32>
    %c0_76 = arith.constant 0 : index
    %c0_77 = arith.constant 0 : index
    %c0_78 = arith.constant 0 : index
    %172 = vector.load %arg19[%c0_76, %c0_77, %c0_78] : memref<2x1x32xf32, #tpu.memory_space<vmem>>, vector<1x1x32xf32>
    %173 = vector.shape_cast %172 : vector<1x1x32xf32> to vector<1x32xf32>
    %cst_79 = arith.constant dense<0.000000e+00> : vector<16xf32>
    %174 = vector.multi_reduction <add>, %169, %cst_79 [1] : vector<16x32xf32> to vector<16xf32>
    %175 = vector.shape_cast %174 : vector<16xf32> to vector<16x1xf32>
    %cst_80 = arith.constant 3.200000e+01 : f32
    %176 = vector.broadcast %cst_80 : f32 to vector<16x1xf32>
    %177 = arith.divf %175, %176 : vector<16x1xf32>
    %178 = vector.broadcast %177 : vector<16x1xf32> to vector<16x32xf32>
    %179 = arith.subf %169, %178 : vector<16x32xf32>
    %180 = arith.mulf %179, %179 : vector<16x32xf32>
    %cst_81 = arith.constant dense<0.000000e+00> : vector<16xf32>
    %181 = vector.multi_reduction <add>, %180, %cst_81 [1] : vector<16x32xf32> to vector<16xf32>
    %182 = vector.shape_cast %181 : vector<16xf32> to vector<16x1xf32>
    %cst_82 = arith.constant 3.200000e+01 : f32
    %183 = vector.broadcast %cst_82 : f32 to vector<16x1xf32>
    %184 = arith.divf %182, %183 : vector<16x1xf32>
    %185 = vector.broadcast %177 : vector<16x1xf32> to vector<16x32xf32>
    %186 = arith.subf %169, %185 : vector<16x32xf32>
    %cst_83 = arith.constant 9.99999996E-13 : f32
    %187 = vector.broadcast %cst_83 : f32 to vector<16x1xf32>
    %188 = arith.addf %184, %187 : vector<16x1xf32>
    %189 = math.rsqrt %188 : vector<16x1xf32>
    %190 = vector.broadcast %189 : vector<16x1xf32> to vector<16x32xf32>
    %191 = arith.mulf %186, %190 : vector<16x32xf32>
    %192 = vector.broadcast %171 : vector<1x32xf32> to vector<16x32xf32>
    %193 = arith.mulf %191, %192 : vector<16x32xf32>
    %194 = vector.broadcast %173 : vector<1x32xf32> to vector<16x32xf32>
    %195 = arith.addf %193, %194 : vector<16x32xf32>
    %c1 = arith.constant 1 : index
    %c0_84 = arith.constant 0 : index
    %c0_85 = arith.constant 0 : index
    %196 = vector.load %arg8[%c1, %c0_84, %c0_85] : memref<2x32x96xbf16, #tpu.memory_space<vmem>>, vector<1x32x96xbf16>
    %197 = vector.shape_cast %196 : vector<1x32x96xbf16> to vector<32x96xbf16>
    %198 = arith.truncf %195 : vector<16x32xf32> to vector<16x32xbf16>
    %cst_86 = arith.constant dense<0.000000e+00> : vector<16x96xf32>
    %199 = tpu.matmul %198, %197, %cst_86 {dimension_numbers = #tpu.dot_dimension_numbers<[1], [0], [0], [1], [0, 0, 1, 1], [], []>} : vector<16x32xbf16>, vector<32x96xbf16>, vector<16x96xf32> -> vector<16x96xf32>
    %c1_87 = arith.constant 1 : index
    %c0_88 = arith.constant 0 : index
    %c0_89 = arith.constant 0 : index
    %200 = vector.load %arg9[%c1_87, %c0_88, %c0_89] : memref<2x1x96xf32, #tpu.memory_space<vmem>>, vector<1x1x96xf32>
    %201 = vector.shape_cast %200 : vector<1x1x96xf32> to vector<1x96xf32>
    %202 = vector.broadcast %201 : vector<1x96xf32> to vector<16x96xf32>
    %203 = arith.addf %199, %202 : vector<16x96xf32>
    %204 = vector.extract_strided_slice %203 {offsets = [0, 0], sizes = [16, 32], strides = [1, 1]} : vector<16x96xf32> to vector<16x32xf32>
    %205 = vector.shape_cast %204 : vector<16x32xf32> to vector<2x8x32xf32>
    %206 = vector.extract_strided_slice %203 {offsets = [0, 32], sizes = [16, 32], strides = [1, 1]} : vector<16x96xf32> to vector<16x32xf32>
    %207 = vector.shape_cast %206 : vector<16x32xf32> to vector<2x8x32xf32>
    %208 = vector.extract_strided_slice %203 {offsets = [0, 64], sizes = [16, 32], strides = [1, 1]} : vector<16x96xf32> to vector<16x32xf32>
    %209 = vector.shape_cast %208 : vector<16x32xf32> to vector<2x8x32xf32>
    %210 = vector.extract_strided_slice %205 {offsets = [0, 0, 0], sizes = [2, 8, 16], strides = [1, 1, 1]} : vector<2x8x32xf32> to vector<2x8x16xf32>
    %211 = arith.truncf %210 : vector<2x8x16xf32> to vector<2x8x16xbf16>
    %212 = vector.extract_strided_slice %207 {offsets = [0, 0, 0], sizes = [2, 8, 16], strides = [1, 1, 1]} : vector<2x8x32xf32> to vector<2x8x16xf32>
    %213 = arith.truncf %212 : vector<2x8x16xf32> to vector<2x8x16xbf16>
    "tpu.trace_start"() <{level = 10 : i32, message = "bqd,bkd->bqk"}> : () -> ()
    %cst_90 = arith.constant dense<0.000000e+00> : vector<2x8x8xf32>
    %214 = tpu.matmul %211, %213, %cst_90 {dimension_numbers = #tpu.dot_dimension_numbers<[2], [2], [1], [1], [0, 0, 0, 1, 1, 1], [0], [0]>} : vector<2x8x16xbf16>, vector<2x8x16xbf16>, vector<2x8x8xf32> -> vector<2x8x8xf32>
    "tpu.trace_stop"() : () -> ()
    %215 = arith.addf %214, %47 : vector<2x8x8xf32>
    %cst_91 = arith.constant dense<0xFF800000> : vector<2x8xf32>
    %216 = vector.multi_reduction <maximumf>, %215, %cst_91 [2] : vector<2x8x8xf32> to vector<2x8xf32>
    %217 = vector.shape_cast %216 : vector<2x8xf32> to vector<2x8x1xf32>
    %218 = vector.broadcast %217 : vector<2x8x1xf32> to vector<2x8x8xf32>
    %219 = arith.subf %215, %218 : vector<2x8x8xf32>
    %220 = math.exp %219 : vector<2x8x8xf32>
    %cst_92 = arith.constant dense<0.000000e+00> : vector<2x8xf32>
    %221 = vector.multi_reduction <add>, %220, %cst_92 [2] : vector<2x8x8xf32> to vector<2x8xf32>
    %222 = vector.shape_cast %221 : vector<2x8xf32> to vector<2x8x1xf32>
    %223 = tpu.reciprocal %222 {approx = true} : vector<2x8x1xf32> -> vector<2x8x1xf32>
    %224 = vector.broadcast %223 : vector<2x8x1xf32> to vector<2x8x8xf32>
    %225 = arith.mulf %220, %224 : vector<2x8x8xf32>
    %226 = arith.truncf %225 : vector<2x8x8xf32> to vector<2x8x8xbf16>
    %227 = vector.extract_strided_slice %209 {offsets = [0, 0, 0], sizes = [2, 8, 16], strides = [1, 1, 1]} : vector<2x8x32xf32> to vector<2x8x16xf32>
    %228 = arith.truncf %227 : vector<2x8x16xf32> to vector<2x8x16xbf16>
    "tpu.trace_start"() <{level = 10 : i32, message = "bqk,bkd->bqd"}> : () -> ()
    %cst_93 = arith.constant dense<0.000000e+00> : vector<2x8x16xf32>
    %229 = tpu.matmul %226, %228, %cst_93 {dimension_numbers = #tpu.dot_dimension_numbers<[2], [1], [1], [2], [0, 0, 0, 1, 1, 2], [0], [0]>} : vector<2x8x8xbf16>, vector<2x8x16xbf16>, vector<2x8x16xf32> -> vector<2x8x16xf32>
    "tpu.trace_stop"() : () -> ()
    %230 = vector.shape_cast %229 : vector<2x8x16xf32> to vector<16x16xf32>
    %231 = vector.extract_strided_slice %205 {offsets = [0, 0, 16], sizes = [2, 8, 16], strides = [1, 1, 1]} : vector<2x8x32xf32> to vector<2x8x16xf32>
    %232 = arith.truncf %231 : vector<2x8x16xf32> to vector<2x8x16xbf16>
    %233 = vector.extract_strided_slice %207 {offsets = [0, 0, 16], sizes = [2, 8, 16], strides = [1, 1, 1]} : vector<2x8x32xf32> to vector<2x8x16xf32>
    %234 = arith.truncf %233 : vector<2x8x16xf32> to vector<2x8x16xbf16>
    "tpu.trace_start"() <{level = 10 : i32, message = "bqd,bkd->bqk"}> : () -> ()
    %cst_94 = arith.constant dense<0.000000e+00> : vector<2x8x8xf32>
    %235 = tpu.matmul %232, %234, %cst_94 {dimension_numbers = #tpu.dot_dimension_numbers<[2], [2], [1], [1], [0, 0, 0, 1, 1, 1], [0], [0]>} : vector<2x8x16xbf16>, vector<2x8x16xbf16>, vector<2x8x8xf32> -> vector<2x8x8xf32>
    "tpu.trace_stop"() : () -> ()
    %236 = arith.addf %235, %47 : vector<2x8x8xf32>
    %cst_95 = arith.constant dense<0xFF800000> : vector<2x8xf32>
    %237 = vector.multi_reduction <maximumf>, %236, %cst_95 [2] : vector<2x8x8xf32> to vector<2x8xf32>
    %238 = vector.shape_cast %237 : vector<2x8xf32> to vector<2x8x1xf32>
    %239 = vector.broadcast %238 : vector<2x8x1xf32> to vector<2x8x8xf32>
    %240 = arith.subf %236, %239 : vector<2x8x8xf32>
    %241 = math.exp %240 : vector<2x8x8xf32>
    %cst_96 = arith.constant dense<0.000000e+00> : vector<2x8xf32>
    %242 = vector.multi_reduction <add>, %241, %cst_96 [2] : vector<2x8x8xf32> to vector<2x8xf32>
    %243 = vector.shape_cast %242 : vector<2x8xf32> to vector<2x8x1xf32>
    %244 = tpu.reciprocal %243 {approx = true} : vector<2x8x1xf32> -> vector<2x8x1xf32>
    %245 = vector.broadcast %244 : vector<2x8x1xf32> to vector<2x8x8xf32>
    %246 = arith.mulf %241, %245 : vector<2x8x8xf32>
    %247 = arith.truncf %246 : vector<2x8x8xf32> to vector<2x8x8xbf16>
    %248 = vector.extract_strided_slice %209 {offsets = [0, 0, 16], sizes = [2, 8, 16], strides = [1, 1, 1]} : vector<2x8x32xf32> to vector<2x8x16xf32>
    %249 = arith.truncf %248 : vector<2x8x16xf32> to vector<2x8x16xbf16>
    "tpu.trace_start"() <{level = 10 : i32, message = "bqk,bkd->bqd"}> : () -> ()
    %cst_97 = arith.constant dense<0.000000e+00> : vector<2x8x16xf32>
    %250 = tpu.matmul %247, %249, %cst_97 {dimension_numbers = #tpu.dot_dimension_numbers<[2], [1], [1], [2], [0, 0, 0, 1, 1, 2], [0], [0]>} : vector<2x8x8xbf16>, vector<2x8x16xbf16>, vector<2x8x16xf32> -> vector<2x8x16xf32>
    "tpu.trace_stop"() : () -> ()
    %251 = vector.shape_cast %250 : vector<2x8x16xf32> to vector<16x16xf32>
    %252 = tpu.concatenate %230, %251 in 1 : vector<16x16xf32>, vector<16x16xf32> -> vector<16x32xf32>
    %c1_98 = arith.constant 1 : index
    %c0_99 = arith.constant 0 : index
    %c0_100 = arith.constant 0 : index
    %253 = vector.load %arg10[%c1_98, %c0_99, %c0_100] : memref<2x32x32xbf16, #tpu.memory_space<vmem>>, vector<1x32x32xbf16>
    %254 = vector.shape_cast %253 : vector<1x32x32xbf16> to vector<32x32xbf16>
    %255 = arith.truncf %252 : vector<16x32xf32> to vector<16x32xbf16>
    %cst_101 = arith.constant dense<0.000000e+00> : vector<16x32xf32>
    %256 = tpu.matmul %255, %254, %cst_101 {dimension_numbers = #tpu.dot_dimension_numbers<[1], [0], [0], [1], [0, 0, 1, 1], [], []>} : vector<16x32xbf16>, vector<32x32xbf16>, vector<16x32xf32> -> vector<16x32xf32>
    %c1_102 = arith.constant 1 : index
    %c0_103 = arith.constant 0 : index
    %c0_104 = arith.constant 0 : index
    %257 = vector.load %arg11[%c1_102, %c0_103, %c0_104] : memref<2x1x32xf32, #tpu.memory_space<vmem>>, vector<1x1x32xf32>
    %258 = vector.shape_cast %257 : vector<1x1x32xf32> to vector<1x32xf32>
    %259 = vector.broadcast %258 : vector<1x32xf32> to vector<16x32xf32>
    %260 = arith.addf %256, %259 : vector<16x32xf32>
    %261 = arith.addf %195, %260 : vector<16x32xf32>
    %c1_105 = arith.constant 1 : index
    %c0_106 = arith.constant 0 : index
    %c0_107 = arith.constant 0 : index
    %262 = vector.load %arg12[%c1_105, %c0_106, %c0_107] : memref<2x1x32xf32, #tpu.memory_space<vmem>>, vector<1x1x32xf32>
    %263 = vector.shape_cast %262 : vector<1x1x32xf32> to vector<1x32xf32>
    %c1_108 = arith.constant 1 : index
    %c0_109 = arith.constant 0 : index
    %c0_110 = arith.constant 0 : index
    %264 = vector.load %arg13[%c1_108, %c0_109, %c0_110] : memref<2x1x32xf32, #tpu.memory_space<vmem>>, vector<1x1x32xf32>
    %265 = vector.shape_cast %264 : vector<1x1x32xf32> to vector<1x32xf32>
    %cst_111 = arith.constant dense<0.000000e+00> : vector<16xf32>
    %266 = vector.multi_reduction <add>, %261, %cst_111 [1] : vector<16x32xf32> to vector<16xf32>
    %267 = vector.shape_cast %266 : vector<16xf32> to vector<16x1xf32>
    %cst_112 = arith.constant 3.200000e+01 : f32
    %268 = vector.broadcast %cst_112 : f32 to vector<16x1xf32>
    %269 = arith.divf %267, %268 : vector<16x1xf32>
    %270 = vector.broadcast %269 : vector<16x1xf32> to vector<16x32xf32>
    %271 = arith.subf %261, %270 : vector<16x32xf32>
    %272 = arith.mulf %271, %271 : vector<16x32xf32>
    %cst_113 = arith.constant dense<0.000000e+00> : vector<16xf32>
    %273 = vector.multi_reduction <add>, %272, %cst_113 [1] : vector<16x32xf32> to vector<16xf32>
    %274 = vector.shape_cast %273 : vector<16xf32> to vector<16x1xf32>
    %cst_114 = arith.constant 3.200000e+01 : f32
    %275 = vector.broadcast %cst_114 : f32 to vector<16x1xf32>
    %276 = arith.divf %274, %275 : vector<16x1xf32>
    %277 = vector.broadcast %269 : vector<16x1xf32> to vector<16x32xf32>
    %278 = arith.subf %261, %277 : vector<16x32xf32>
    %cst_115 = arith.constant 9.99999996E-13 : f32
    %279 = vector.broadcast %cst_115 : f32 to vector<16x1xf32>
    %280 = arith.addf %276, %279 : vector<16x1xf32>
    %281 = math.rsqrt %280 : vector<16x1xf32>
    %282 = vector.broadcast %281 : vector<16x1xf32> to vector<16x32xf32>
    %283 = arith.mulf %278, %282 : vector<16x32xf32>
    %284 = vector.broadcast %263 : vector<1x32xf32> to vector<16x32xf32>
    %285 = arith.mulf %283, %284 : vector<16x32xf32>
    %286 = vector.broadcast %265 : vector<1x32xf32> to vector<16x32xf32>
    %287 = arith.addf %285, %286 : vector<16x32xf32>
    %c1_116 = arith.constant 1 : index
    %c0_117 = arith.constant 0 : index
    %c0_118 = arith.constant 0 : index
    %288 = vector.load %arg14[%c1_116, %c0_117, %c0_118] : memref<2x32x64xbf16, #tpu.memory_space<vmem>>, vector<1x32x64xbf16>
    %289 = vector.shape_cast %288 : vector<1x32x64xbf16> to vector<32x64xbf16>
    %290 = arith.truncf %287 : vector<16x32xf32> to vector<16x32xbf16>
    %cst_119 = arith.constant dense<0.000000e+00> : vector<16x64xf32>
    %291 = tpu.matmul %290, %289, %cst_119 {dimension_numbers = #tpu.dot_dimension_numbers<[1], [0], [0], [1], [0, 0, 1, 1], [], []>} : vector<16x32xbf16>, vector<32x64xbf16>, vector<16x64xf32> -> vector<16x64xf32>
    %c1_120 = arith.constant 1 : index
    %c0_121 = arith.constant 0 : index
    %c0_122 = arith.constant 0 : index
    %292 = vector.load %arg15[%c1_120, %c0_121, %c0_122] : memref<2x1x64xf32, #tpu.memory_space<vmem>>, vector<1x1x64xf32>
    %293 = vector.shape_cast %292 : vector<1x1x64xf32> to vector<1x64xf32>
    %294 = vector.broadcast %293 : vector<1x64xf32> to vector<16x64xf32>
    %295 = arith.addf %291, %294 : vector<16x64xf32>
    %296 = arith.mulf %295, %295 : vector<16x64xf32>
    %297 = arith.mulf %295, %296 : vector<16x64xf32>
    %cst_123 = arith.constant 4.471500e-02 : f32
    %298 = vector.broadcast %cst_123 : f32 to vector<16x64xf32>
    %299 = arith.mulf %298, %297 : vector<16x64xf32>
    %300 = arith.addf %295, %299 : vector<16x64xf32>
    %cst_124 = arith.constant 0.797884583 : f32
    %301 = vector.broadcast %cst_124 : f32 to vector<16x64xf32>
    %302 = arith.mulf %301, %300 : vector<16x64xf32>
    %303 = math.tanh %302 : vector<16x64xf32>
    %cst_125 = arith.constant 1.000000e+00 : f32
    %304 = vector.broadcast %cst_125 : f32 to vector<16x64xf32>
    %305 = arith.addf %304, %303 : vector<16x64xf32>
    %cst_126 = arith.constant 5.000000e-01 : f32
    %306 = vector.broadcast %cst_126 : f32 to vector<16x64xf32>
    %307 = arith.mulf %306, %305 : vector<16x64xf32>
    %308 = arith.mulf %295, %307 : vector<16x64xf32>
    %c1_127 = arith.constant 1 : index
    %c0_128 = arith.constant 0 : index
    %c0_129 = arith.constant 0 : index
    %309 = vector.load %arg16[%c1_127, %c0_128, %c0_129] : memref<2x64x32xbf16, #tpu.memory_space<vmem>>, vector<1x64x32xbf16>
    %310 = vector.shape_cast %309 : vector<1x64x32xbf16> to vector<64x32xbf16>
    %311 = arith.truncf %308 : vector<16x64xf32> to vector<16x64xbf16>
    %cst_130 = arith.constant dense<0.000000e+00> : vector<16x32xf32>
    %312 = tpu.matmul %311, %310, %cst_130 {dimension_numbers = #tpu.dot_dimension_numbers<[1], [0], [0], [1], [0, 0, 1, 1], [], []>} : vector<16x64xbf16>, vector<64x32xbf16>, vector<16x32xf32> -> vector<16x32xf32>
    %c1_131 = arith.constant 1 : index
    %c0_132 = arith.constant 0 : index
    %c0_133 = arith.constant 0 : index
    %313 = vector.load %arg17[%c1_131, %c0_132, %c0_133] : memref<2x1x32xf32, #tpu.memory_space<vmem>>, vector<1x1x32xf32>
    %314 = vector.shape_cast %313 : vector<1x1x32xf32> to vector<1x32xf32>
    %315 = vector.broadcast %314 : vector<1x32xf32> to vector<16x32xf32>
    %316 = arith.addf %312, %315 : vector<16x32xf32>
    %317 = arith.addf %287, %316 : vector<16x32xf32>
    %c1_134 = arith.constant 1 : index
    %c0_135 = arith.constant 0 : index
    %c0_136 = arith.constant 0 : index
    %318 = vector.load %arg18[%c1_134, %c0_135, %c0_136] : memref<2x1x32xf32, #tpu.memory_space<vmem>>, vector<1x1x32xf32>
    %319 = vector.shape_cast %318 : vector<1x1x32xf32> to vector<1x32xf32>
    %c1_137 = arith.constant 1 : index
    %c0_138 = arith.constant 0 : index
    %c0_139 = arith.constant 0 : index
    %320 = vector.load %arg19[%c1_137, %c0_138, %c0_139] : memref<2x1x32xf32, #tpu.memory_space<vmem>>, vector<1x1x32xf32>
    %321 = vector.shape_cast %320 : vector<1x1x32xf32> to vector<1x32xf32>
    %cst_140 = arith.constant dense<0.000000e+00> : vector<16xf32>
    %322 = vector.multi_reduction <add>, %317, %cst_140 [1] : vector<16x32xf32> to vector<16xf32>
    %323 = vector.shape_cast %322 : vector<16xf32> to vector<16x1xf32>
    %cst_141 = arith.constant 3.200000e+01 : f32
    %324 = vector.broadcast %cst_141 : f32 to vector<16x1xf32>
    %325 = arith.divf %323, %324 : vector<16x1xf32>
    %326 = vector.broadcast %325 : vector<16x1xf32> to vector<16x32xf32>
    %327 = arith.subf %317, %326 : vector<16x32xf32>
    %328 = arith.mulf %327, %327 : vector<16x32xf32>
    %cst_142 = arith.constant dense<0.000000e+00> : vector<16xf32>
    %329 = vector.multi_reduction <add>, %328, %cst_142 [1] : vector<16x32xf32> to vector<16xf32>
    %330 = vector.shape_cast %329 : vector<16xf32> to vector<16x1xf32>
    %cst_143 = arith.constant 3.200000e+01 : f32
    %331 = vector.broadcast %cst_143 : f32 to vector<16x1xf32>
    %332 = arith.divf %330, %331 : vector<16x1xf32>
    %333 = vector.broadcast %325 : vector<16x1xf32> to vector<16x32xf32>
    %334 = arith.subf %317, %333 : vector<16x32xf32>
    %cst_144 = arith.constant 9.99999996E-13 : f32
    %335 = vector.broadcast %cst_144 : f32 to vector<16x1xf32>
    %336 = arith.addf %332, %335 : vector<16x1xf32>
    %337 = math.rsqrt %336 : vector<16x1xf32>
    %338 = vector.broadcast %337 : vector<16x1xf32> to vector<16x32xf32>
    %339 = arith.mulf %334, %338 : vector<16x32xf32>
    %340 = vector.broadcast %319 : vector<1x32xf32> to vector<16x32xf32>
    %341 = arith.mulf %339, %340 : vector<16x32xf32>
    %342 = vector.broadcast %321 : vector<1x32xf32> to vector<16x32xf32>
    %343 = arith.addf %341, %342 : vector<16x32xf32>
    %344 = tpu.iota {dimensions = array<i32: 1>} : vector<2x16xi32>
    %345 = tpu.iota {dimensions = array<i32: 0>} : vector<2x16xi32>
    %c8_i32 = arith.constant 8 : i32
    %346 = vector.broadcast %c8_i32 : i32 to vector<2x16xi32>
    %347 = arith.muli %345, %346 : vector<2x16xi32>
    %348 = arith.cmpi eq, %344, %347 : vector<2x16xi32>
    %349 = arith.extui %348 : vector<2x16xi1> to vector<2x16xi32>
    %350 = arith.sitofp %349 : vector<2x16xi32> to vector<2x16xf32>
    %351 = arith.truncf %350 : vector<2x16xf32> to vector<2x16xbf16>
    %352 = arith.truncf %343 : vector<16x32xf32> to vector<16x32xbf16>
    %cst_145 = arith.constant dense<0.000000e+00> : vector<2x32xf32>
    %353 = tpu.matmul %351, %352, %cst_145 {dimension_numbers = #tpu.dot_dimension_numbers<[1], [0], [0], [1], [0, 0, 1, 1], [], []>} : vector<2x16xbf16>, vector<16x32xbf16>, vector<2x32xf32> -> vector<2x32xf32>
    %c0_146 = arith.constant 0 : index
    %c0_147 = arith.constant 0 : index
    %354 = vector.load %arg20[%c0_146, %c0_147] : memref<32x32xbf16, #tpu.memory_space<vmem>>, vector<32x32xbf16>
    %355 = arith.truncf %353 : vector<2x32xf32> to vector<2x32xbf16>
    %cst_148 = arith.constant dense<0.000000e+00> : vector<2x32xf32>
    %356 = tpu.matmul %355, %354, %cst_148 {dimension_numbers = #tpu.dot_dimension_numbers<[1], [0], [0], [1], [0, 0, 1, 1], [], []>} : vector<2x32xbf16>, vector<32x32xbf16>, vector<2x32xf32> -> vector<2x32xf32>
    %c0_149 = arith.constant 0 : index
    %c0_150 = arith.constant 0 : index
    %357 = vector.load %arg21[%c0_149, %c0_150] : memref<1x32xf32, #tpu.memory_space<vmem>>, vector<1x32xf32>
    %358 = vector.broadcast %357 : vector<1x32xf32> to vector<2x32xf32>
    %359 = arith.addf %356, %358 : vector<2x32xf32>
    %c0_151 = arith.constant 0 : index
    %c0_152 = arith.constant 0 : index
    %360 = vector.load %arg22[%c0_151, %c0_152] : memref<32x2xbf16, #tpu.memory_space<vmem>>, vector<32x2xbf16>
    %361 = arith.truncf %359 : vector<2x32xf32> to vector<2x32xbf16>
    %cst_153 = arith.constant dense<0.000000e+00> : vector<2x2xf32>
    %362 = tpu.matmul %361, %360, %cst_153 {dimension_numbers = #tpu.dot_dimension_numbers<[1], [0], [0], [1], [0, 0, 1, 1], [], []>} : vector<2x32xbf16>, vector<32x2xbf16>, vector<2x2xf32> -> vector<2x2xf32>
    %c0_154 = arith.constant 0 : index
    %c0_155 = arith.constant 0 : index
    %363 = vector.load %arg23[%c0_154, %c0_155] : memref<1x2xf32, #tpu.memory_space<vmem>>, vector<1x2xf32>
    %364 = vector.broadcast %363 : vector<1x2xf32> to vector<2x2xf32>
    %365 = arith.addf %362, %364 : vector<2x2xf32>
    %c0_156 = arith.constant 0 : index
    %c0_157 = arith.constant 0 : index
    %366 = vector.load %arg24[%c0_156, %c0_157] : memref<2x2xf32, #tpu.memory_space<vmem>>, vector<2x2xf32>
    tpu.vector_store %arg24[%c0_156, %c0_157], %365 {strides = array<i32>} : memref<2x2xf32, #tpu.memory_space<vmem>>, vector<2x2xf32>,
    return
  }
}

</mosaic_0001>

<bundles_post_ra>
// kernel: bert_model_forward.1
= control target key start
LH: loop header
LB: loop body
LE: loop exit
PB: predicated region body
PF: predicated region fallthrough
CT: control target
= control target key end

     0   :  { %s3411_s0 = inlined_call_operand.vmem [shape: s32[16,1], index: 0, kind: input, shape index: {}]   ;;  %s3412_s1 = inlined_call_operand.vmem [shape: s32[16,1], index: 1, kind: input, shape index: {}]   ;;  %s3413_s2 = inlined_call_operand.vmem [shape: f32[2,1,8], index: 2, kind: input, shape index: {}]   ;;  %s3414_s3 = inlined_call_operand.vmem [shape: bf16[128,32], index: 3, kind: input, shape index: {}]   ;;  %s3415_s4 = inlined_call_operand.vmem [shape: bf16[8,32], index: 4, kind: input, shape index: {}]   ;;  %s3416_s5 = inlined_call_operand.vmem [shape: f32[16,32], index: 5, kind: input, shape index: {}]   ;;  %s3417_s6 = inlined_call_operand.vmem [shape: f32[1,32], index: 6, kind: input, shape index: {}]   ;;  %s3418_s7 = inlined_call_operand.vmem [shape: f32[1,32], index: 7, kind: input, shape index: {}]   ;;  %s3419_s8 = inlined_call_operand.vmem [shape: bf16[2,32,96], index: 8, kind: input, shape index: {}]   ;;  %s3420_s9 = inlined_call_operand.vmem [shape: f32[2,1,96], index: 9, kind: input, shape index: {}]   ;;  %s3421_s10 = inlined_call_operand.vmem [shape: bf16[2,32,32], index: 10, kind: input, shape index: {}]   ;;  %s3422_s11 = inlined_call_operand.vmem [shape: f32[2,1,32], index: 11, kind: input, shape index: {}]   ;;  %s3423_s12 = inlined_call_operand.vmem [shape: f32[2,1,32], index: 12, kind: input, shape index: {}]   ;;  %s3424_s13 = inlined_call_operand.vmem [shape: f32[2,1,32], index: 13, kind: input, shape index: {}]   ;;  %s3425_s14 = inlined_call_operand.vmem [shape: bf16[2,32,64], index: 14, kind: input, shape index: {}]   ;;  %s3426_s15 = inlined_call_operand.vmem [shape: f32[2,1,64], index: 15, kind: input, shape index: {}]   ;;  %s3427_s16 = inlined_call_operand.vmem [shape: bf16[2,64,32], index: 16, kind: input, shape index: {}]   ;;  %s3428_s17 = inlined_call_operand.vmem [shape: f32[2,1,32], index: 17, kind: input, shape index: {}]   ;;  %s3429_s18 = inlined_call_operand.vmem [shape: f32[2,1,32], index: 18, kind: input, shape index: {}]   ;;  %s3430_s19 = inlined_call_operand.vmem [shape: f32[2,1,32], index: 19, kind: input, shape index: {}]   ;;  %s3431_s20 = inlined_call_operand.vmem [shape: bf16[32,32], index: 20, kind: input, shape index: {}]   ;;  %s3432_s21 = inlined_call_operand.vmem [shape: f32[1,32], index: 21, kind: input, shape index: {}]   ;;  %s3433_s22 = inlined_call_operand.vmem [shape: bf16[32,2], index: 22, kind: input, shape index: {}]   ;;  %s3434_s23 = inlined_call_operand.vmem [shape: f32[1,2], index: 23, kind: input, shape index: {}]   ;;  %s3435_s24 = inlined_call_operand.hbm [shape: f32[2,2], index: 24, kind: output, shape index: {}]  }
   0x1   :  { %3443 = sst [smem:[#allocation5_spill]] %s3411_s0 }
   0x2   :  { %3444 = sst [smem:[#allocation6_spill]] %s3412_s1 }
   0x3   :  { %3445 = sst [smem:[#allocation7_spill]] %s3413_s2 }
   0x4   :  { %3446 = sst [smem:[#allocation8_spill]] %s3414_s3 }
   0x5   :  { %3447 = sst [smem:[#allocation9_spill]] %s3415_s4 }
   0x6   :  { %3448 = sst [smem:[#allocation10_spill]] %s3416_s5 }
   0x7   :  { %3449 = sst [smem:[#allocation11_spill]] %s3417_s6 }
   0x8   :  { %3450 = sst [smem:[#allocation12_spill]] %s3418_s7 }
   0x9   :  { %3451 = sst [smem:[#allocation13_spill]] %s3419_s8 }
   0xa   :  { %3452 = sst [smem:[#allocation14_spill]] %s3430_s19 }
   0xb   :  { %s3453_s27 = sld [smem:[#allocation6_spill]]  ;;  %v2790_v2 = vmov 0   ;;  %v2791_v6 = vmov 0.0   ;;  %vm2792_vm0 = vmmov 0   ;;  %vm132_vm1 = vcmask 1043456  }
   0xc   :  { %s3454_s19 = sld [smem:[#allocation5_spill]]  ;;  %2665 = vset.pattern.permute.xlu1 %v2790_v2  ;;  %2664 = vset.pattern.permute.xlu0 %v2790_v2 }
   0xd   :  { %s3455_s30 = sld [smem:[#allocation8_spill]]  ;;  %2443 = vmatprep.subr.bf16.mxu1 %v2791_v6  ;;  %2437 = vmatprep.subr.bf16.mxu0 %v2791_v6 }
   0xe   :  { %2459 = vmatprep.mubr.msk.bf16.mxu1 %vm2792_vm0, %v2791_v6  ;;  %2439 = vmatprep.mubr.msk.bf16.mxu0 %vm2792_vm0, %v2791_v6 }
  0x11   :  { %v81_v0 = vld [vmem:[%s3453_s27] sm:$0xff]  ;;  %v82_v3 = vld [vmem:[%s3453_s27 + $0x8] sm:$0xff]  ;;  %s3456_s27 = sld [smem:[#allocation9_spill]] }
  0x12   :  { %v79_v1 = vld [vmem:[%s3454_s19] sm:$0xff]  ;;  %99 = vperm.xlu0 %2664, %v81_v0   ;;  %v80_v5 = vld [vmem:[%s3454_s19 + $0x8] sm:$0xff] }
  0x13   :  { %86 = vperm.xlu1 %2665, %v79_v1   ;;  %v2676_v4 = vld [vmem:[%s3455_s30 + $0x38] sm:$0xff]   ;;  %v2677_v7 = vld [vmem:[%s3455_s30 + $0x30] sm:$0xff]   ;;  %v2678_v8 = vld [vmem:[%s3455_s30 + $0x28] sm:$0xff]  }
  0x14   :  { %2444 = vmatpush3.bf16.msra.mxu1 %v2676_v4  ;;  %v2679_v10 = vld [vmem:[%s3455_s30 + $0x20] sm:$0xff]   ;;  %v2680_v12 = vld [vmem:[%s3455_s30 + $0x18] sm:$0xff]   ;;  %v2681_v13 = vld [vmem:[%s3455_s30 + $0x10] sm:$0xff]  }
  0x15   :  { %2445 = vmatprep.subr.bf16.mxu1 %v2791_v6  ;;  %v2682_v14 = vld [vmem:[%s3455_s30 + $0x8] sm:$0xff]  }
  0x16   :  { %102 = vperm.xlu0 %2664, %v82_v3  }
  0x17   :  { %89 = vperm.xlu1 %2665, %v80_v5   ;;  %v127_v9 = vld [vmem:[%s3456_s27] sm:$0xf] }
  0x18   :  { %2446 = vmatpush3.bf16.msra.mxu1 %v2677_v7  ;;  %v134_v11 = vsel %vm132_vm1, %v127_v9, 0 }
  0x19   :  { %2447 = vmatprep.subr.bf16.mxu1 %v2791_v6  ;;  %2438 = vmatpush3.bf16.msra.mxu0 %v134_v11 }
  0x1a   :  { %2463 = vmatprep.subr.bf16.mxu0 %v2791_v6 }
  0x1c   :  { %2448 = vmatpush3.bf16.msra.mxu1 %v2678_v8 }
  0x1d   :  { %2449 = vmatprep.subr.bf16.mxu1 %v2791_v6 }
  0x20   :  { %2450 = vmatpush3.bf16.msra.mxu1 %v2679_v10 }
  0x21   :  { %2451 = vmatprep.subr.bf16.mxu1 %v2791_v6 }
  0x24   :  { %2452 = vmatpush3.bf16.msra.mxu1 %v2680_v12 }
  0x25   :  { %2453 = vmatprep.subr.bf16.mxu1 %v2791_v6 }
  0x28   :  { %2454 = vmatpush3.bf16.msra.mxu1 %v2681_v13 }
  0x29   :  { %2455 = vmatprep.subr.bf16.mxu1 %v2791_v6 }
  0x2a   :  { %29 = vsyncpa [#allocation3], 0  ;;  %v2683_v15 = vld [vmem:[%s3455_s30] sm:$0xff]   ;;  %v83_v16 = vlaneseq  ;;  %vm128_vm7 = vcmask 64512   ;;  %v2793_v25 = vmov 1.0|1.0  }
  0x2b   :  { %s3457_s1 = sld [smem:[#allocation10_spill]]  ;;  %vm272_vm8 = vcmask 261120   ;;  %v2260_v8 = vld [vmem:[%s3420_s9] ss:$0 sm:$0xff]  ;;  %vm403_vm9 = vcmask 130048   ;;  %s2795_s29 = smov 64  }
  0x2c   :  { %2456 = vmatpush3.bf16.msra.mxu1 %v2682_v14  ;;  %v2982_v17 = vand.u32 127, %v83_v16  ;;  %s3458_s6 = sld [smem:[#allocation13_spill]]  ;;  %s2796_s0 = smov 80   ;;  %vm1089_vm10 = vcmask 523264   ;;  %vm2225_vm12 = vcmask 9216  }
  0x2d   :  { %2457 = vmatprep.subr.bf16.mxu1 %v2791_v6  ;;  %s3459_s3 = sld [smem:[#allocation11_spill]]  ;;  %s2797_s7 = smov 112  }
  0x2e   :  { %s3460_s4 = sld [smem:[#allocation12_spill]]  ;;  %s2799_s19 = smov 16  }
  0x2f   :  { %s3461_s27 = sld [smem:[#allocation7_spill]] }
  0x30   :  { %2458 = vmatpush3.bf16.msra.mxu1 %v2683_v15 }
  0x31   :  { %2489 = vmatprep.subr.bf16.mxu1 %v2791_v6  ;;  %v266_v29 = vld [vmem:[%s3457_s1] sm:$0xff]  ;;  %v267_v36 = vld [vmem:[%s3457_s1 + $0x8] sm:$0xff]  ;;  %s2794_s1 = smov 96  }
  0x32   :  { %v2684_v52 = vld [vmem:[%s3458_s6 + $0x8] sm:$0xff]   ;;  %v2685_v53 = vld [vmem:[%s3458_s6] sm:$0xff]  }
  0x33   :  { %v2256_v62 = vld [vmem:[%s3459_s3] ss:$0 sm:$0xff]  ;;  %s2798_s3 = smov 48  }
  0x34   :  { %v2257_v2 = vld [vmem:[%s3460_s4] ss:$0 sm:$0xff] }
  0x8d   :  { %v100_v18 = vpop.permute.xlu0 %99 }
  0x8e   :  { %v87_v19 = vpop.permute.xlu1 %86  ;;  %vm104_vm2 = vcmp.eq.s32.totalorder %v2982_v17, %v100_v18 }
  0x8f   :  { %vm91_vm3 = vcmp.eq.s32.totalorder %v2982_v17, %v87_v19  ;;  %v2243_v22 = vsel %vm104_vm2, 1.0, %v2791_v6 }
  0x91   :  { %v103_v20 = vpop.permute.xlu0 %102 }
  0x92   :  { %v90_v21 = vpop.permute.xlu1 %89  ;;  %vm105_vm4 = vcmp.eq.s32.totalorder %v2982_v17, %v103_v20 }
  0x93   :  { %vm92_vm5 = vcmp.eq.s32.totalorder %v2982_v17, %v90_v21  ;;  %v2244_v23 = vsel %vm105_vm4, 1.0, %v2791_v6 }
  0x94   :  { %vm2254_vm6 = vmpackc.low %vm92_vm5, %vm91_vm3  ;;  %v110_v24 = vpack.c.bf16 %v2244_v23, %v2243_v22  ;;  %v3054_v23 = vld [vmem:[%s3461_s27] ss:$0 sm:$0xff] }
  0x95   :  { %2460 = vmatmul.mubr.msk.bf16.vlgmr.msra.gmra.mxu1 %vm2254_vm6, %v2793_v25 }
  0x96   :  { %2491 = vmatprep.mubr.msk.bf16.mxu1 %vm2792_vm0, %v2791_v6  ;;  %2440 = vmatmul.mubr.msk.bf16.vlgmr.msra.gmra.mxu0 %vm128_vm7, %v110_v24 }
  0x97   :  { %2467 = vmatprep.mubr.msk.bf16.mxu0 %vm2792_vm0, %v2791_v6  ;;  %2464 = vmatpush3.bf16.msra.mxu0 %v2684_v52 }
  0x98   :  { %2465 = vmatprep.subr.bf16.mxu0 %v2791_v6 }
  0x9b   :  { %2466 = vmatpush3.bf16.msra.mxu0 %v2685_v53 }
  0x9c   :  { %2471 = vmatprep.subr.bf16.mxu0 %v2791_v6 }
 0x155   :  { %v259_v26 = vpop.f32.mrf.mxu1 }
 0x156   :  { %v170_v27 = vpop.f32.mrf.mxu0 }
 0x157   :  { %v2461_v28 = vpop.f32.mrf.mxu1  ;;  %v260_v30 = vadd.f32 %v259_v26, %v170_v27 }
 0x158   :  { %v2441_v31 = vpop.f32.mrf.mxu0 }
 0x159   :  { %v262_v32 = vpop.f32.mrf.mxu1  ;;  %v268_v33 = vadd.f32 %v266_v29, %v260_v30  ;;  %v3061_v30 = vld [vmem:[%s3461_s27 + $0x1] ss:$0 sm:$0xff]  ;;  %s3462_s27 = sld [smem:[#allocation14_spill]] }
 0x15a   :  { %v173_v34 = vpop.f32.mrf.mxu0 }
 0x15b   :  { %v2462_v35 = vpop.f32.mrf.mxu1  ;;  %v263_v37 = vadd.f32 %v262_v32, %v173_v34  ;;  %v273_v38 = vsel %vm272_vm8, %v268_v33, 0.0 }
 0x15c   :  { %v2442_v39 = vpop.f32.mrf.mxu0  ;;  %274 = vadd.xlane.f32.xlu0 %v273_v38 }
 0x15d   :  { %v269_v40 = vadd.f32 %v267_v36, %v263_v37 }
 0x15f   :  { %v276_v41 = vsel %vm272_vm8, %v269_v40, 0.0 }
 0x160   :  { %277 = vadd.xlane.f32.xlu1 %v276_v41 }
 0x1e5   :  { %v275_v42 = vpop.xlane.xlu0 %274 }
 0x1e6   :  { %v280_v43 = vmul.f32 0.03125, %v275_v42 }
 0x1e8   :  { %v282_v44 = vsub.f32 %v268_v33, %v280_v43 }
 0x1e9   :  { %v278_v45 = vpop.xlane.xlu1 %277 }
 0x1ea   :  { %v281_v46 = vmul.f32 0.03125, %v278_v45  ;;  %v284_v47 = vmul.f32 %v282_v44, %v282_v44 }
 0x1ec   :  { %v283_v48 = vsub.f32 %v269_v40, %v281_v46  ;;  %v286_v49 = vsel %vm272_vm8, %v284_v47, 0.0 }
 0x1ed   :  { %287 = vadd.xlane.f32.xlu0 %v286_v49 }
 0x1ee   :  { %v285_v50 = vmul.f32 %v283_v48, %v283_v48 }
 0x1f0   :  { %v289_v51 = vsel %vm272_vm8, %v285_v50, 0.0 }
 0x1f1   :  { %290 = vadd.xlane.f32.xlu0 %v289_v51 }
 0x276   :  { %v288_v54 = vpop.xlane.xlu0 %287 }
 0x277   :  { %v292_v55 = vmul.f32 0.03125, %v288_v54 }
 0x279   :  { %v294_v56 = vadd.f32 1e-12, %v292_v55 }
 0x27a   :  { %v291_v57 = vpop.xlane.xlu0 %290 }
 0x27b   :  { %2708 = vrsqrt.f32 %v294_v56  ;;  %v293_v58 = vmul.f32 0.03125, %v291_v57 }
 0x27d   :  { %v295_v59 = vadd.f32 1e-12, %v293_v58 }
 0x27f   :  { %2710 = vrsqrt.f32 %v295_v59 }
 0x288   :  { %v2709_v60 = vpop.eup %2708 }
 0x289   :  { %v298_v61 = vmul.f32 %v2709_v60, %v282_v44 }
 0x28b   :  { %v306_v1 = vmul.f32 %v2256_v62, %v298_v61 }
 0x28c   :  { %v2711_v63 = vpop.eup %2710 }
 0x28d   :  { %v299_v0 = vmul.f32 %v2711_v63, %v283_v48  ;;  %v3019_v4 = vadd.f32 %v2257_v2, %v306_v1 }
 0x28f   :  { %v307_v3 = vmul.f32 %v2256_v62, %v299_v0 }
 0x291   :  { %v3021_v5 = vadd.f32 %v2257_v2, %v307_v3 }
 0x293   :  { %v334_v7 = vpack.c.bf16 %v3021_v5, %v3019_v4 }
 0x295   :  { %2468 = vmatmul.mubr.msk.bf16.vlgmr.msra.gmra.mxu0 %vm272_vm8, %v334_v7 }
 0x296   :  { %2473 = vmatprep.mubr.msk.bf16.mxu0 %vm2792_vm0, %v2791_v6 }
 0x355   :  { %v391_v9 = vpop.f32.mrf.mxu0 }
 0x356   :  { %v392_v10 = vadd.f32 %v2260_v8, %v391_v9 }
 0x357   :  { %v2469_v11 = vpop.f32.mrf.mxu0 }
 0x358   :  { %v3031_v12 = vpack.c.bf16 %v392_v10, %v392_v10 }
 0x359   :  { %v394_v13 = vpop.f32.mrf.mxu0 }
 0x35a   :  { %v395_v14 = vadd.f32 %v2260_v8, %v394_v13  ;;  %401 = vrot.lane.b32.xlu1 %v3031_v12, %s2794_s1 }
 0x35b   :  { %v2470_v15 = vpop.f32.mrf.mxu0 }
 0x35c   :  { %v3035_v18 = vpack.c.bf16 %v395_v14, %v395_v14 }
 0x35e   :  { %451 = vrot.lane.b32.xlu0 %v3035_v18, %s2794_s1 }
 0x3cc   :  { %v402_v19 = vpop.permute.xlu1 %401 }
 0x3cd   :  { %v408_v20 = vsel %vm403_vm9, %v402_v19, 0 }
 0x3ce   :  { %2472 = vmatpush3.bf16.xpose.msra.mxu0 %v408_v20 }
 0x3cf   :  { %2477 = vmatprep.subr.bf16.mxu0 %v2791_v6 }
 0x3d0   :  { %v452_v21 = vpop.permute.xlu0 %451 }
 0x3d1   :  { %v457_v22 = vsel %vm403_vm9, %v452_v21, 0 }
 0x3d5   :  { %2474 = vmatmul.mubr.msk.bf16.vlgmr.msra.gmra.mxu0 %vm403_vm9, %v3031_v12 }
 0x3d6   :  { %2478 = vmatpush3.bf16.xpose.msra.mxu0 %v457_v22  ;;  %2479 = vmatprep.mubr.msk.bf16.mxu0 %vm2792_vm0, %v2791_v6 }
 0x3d7   :  { %2483 = vmatprep.subr.bf16.mxu0 %v2791_v6 }
 0x3dd   :  { %2480 = vmatmul.mubr.msk.bf16.vlgmr.msra.gmra.mxu0 %vm403_vm9, %v3035_v18 }
 0x3de   :  { %2485 = vmatprep.mubr.msk.bf16.mxu0 %vm2792_vm0, %v2791_v6 }
 0x495   :  { %v444_v24 = vpop.f32.mrf.mxu0 }
 0x496   :  { %v445_v25 = vadd.f32 %v3054_v23, %v444_v24 }
 0x497   :  { %v2475_v26 = vpop.f32.mrf.mxu0 }
 0x498   :  { %v499_v27 = vsel %vm128_vm7, %v445_v25, -inf }
 0x499   :  { %500 = vmax.xlane.f32.xlu1 %v499_v27  ;;  %v447_v28 = vpop.f32.mrf.mxu0 }
 0x49b   :  { %v2476_v29 = vpop.f32.mrf.mxu0 }
 0x49d   :  { %v493_v31 = vpop.f32.mrf.mxu0 }
 0x49e   :  { %v494_v32 = vadd.f32 %v3061_v30, %v493_v31 }
 0x49f   :  { %v2481_v33 = vpop.f32.mrf.mxu0 }
 0x4a0   :  { %v502_v34 = vsel %vm128_vm7, %v494_v32, -inf }
 0x4a1   :  { %503 = vmax.xlane.f32.xlu0 %v502_v34  ;;  %v496_v35 = vpop.f32.mrf.mxu0 }
 0x4a3   :  { %v2482_v36 = vpop.f32.mrf.mxu0 }
 0x4aa   :  { %523 = vrot.lane.b32.xlu1 %v3031_v12, %s2795_s29 }
 0x522   :  { %v501_v37 = vpop.xlane.xlu1 %500 }
 0x523   :  { %v505_v38 = vsub.f32 %v445_v25, %v501_v37 }
 0x525   :  { %v507_v39 = vmul.f32 1.442695, %v505_v38 }
 0x526   :  { %v524_v40 = vpop.permute.xlu1 %523 }
 0x527   :  { %2712 = vpow2.f32 %v507_v39  ;;  %v529_v41 = vsel %vm132_vm1, %v524_v40, 0 }
 0x528   :  { %2484 = vmatpush3.bf16.msra.mxu0 %v529_v41 }
 0x529   :  { %2495 = vmatprep.subr.bf16.mxu0 %v2791_v6 }
 0x52a   :  { %v504_v42 = vpop.xlane.xlu0 %503 }
 0x52b   :  { %v506_v43 = vsub.f32 %v494_v32, %v504_v42 }
 0x52d   :  { %v509_v44 = vmul.f32 1.442695, %v506_v43 }
 0x52f   :  { %2714 = vpow2.f32 %v509_v44 }
 0x534   :  { %v2713_v45 = vpop.eup %2712 }
 0x535   :  { %v511_v46 = vsel %vm128_vm7, %v2713_v45, 0.0 }
 0x536   :  { %512 = vadd.xlane.f32.xlu1 %v511_v46 }
 0x53c   :  { %v2715_v47 = vpop.eup %2714 }
 0x53d   :  { %v514_v48 = vsel %vm128_vm7, %v2715_v47, 0.0 }
 0x53e   :  { %515 = vadd.xlane.f32.xlu0 %v514_v48 }
 0x547   :  { %621 = vrot.lane.b32.xlu1 %v3031_v12, %s2796_s0 }
 0x54b   :  { %671 = vrot.lane.b32.xlu1 %v3035_v18, %s2796_s0 }
 0x54f   :  { %669 = vrot.lane.b32.xlu1 %v3035_v18, %s2797_s7 }
 0x554   :  { %571 = vrot.lane.b32.xlu0 %v3035_v18, %s2795_s29 }
 0x558   :  { %619 = vrot.lane.b32.xlu0 %v3031_v12, %s2797_s7 }
 0x5bf   :  { %v513_v49 = vpop.xlane.xlu1 %512 }
 0x5c0   :  { %2716 = vrcp.f32 %v513_v49 }
 0x5c3   :  { %v622_v55 = vpop.permute.xlu1 %621 }
 0x5c4   :  { %v627_v57 = vsel %vm403_vm9, %v622_v55, 0 }
 0x5c7   :  { %v516_v50 = vpop.xlane.xlu0 %515  ;;  %v672_v60 = vpop.permute.xlu1 %671 }
 0x5c8   :  { %2718 = vrcp.f32 %v516_v50  ;;  %v677_v63 = vsel %vm403_vm9, %v672_v60, 0  ;;  %v2686_v50 = vld [vmem:[%s3421_s10 + $0x8] sm:$0xff]  }
 0x5cb   :  { %v572_v51 = vpop.permute.xlu0 %571  ;;  %v670_v0 = vpop.permute.xlu1 %669 }
 0x5cc   :  { %v577_v52 = vsel %vm132_vm1, %v572_v51, 0  ;;  %v2687_v51 = vld [vmem:[%s3421_s10] sm:$0xff]  }
 0x5cd   :  { %v2717_v53 = vpop.eup %2716  ;;  %2490 = vmatpush3.bf16.msra.mxu1 %v577_v52 }
 0x5ce   :  { %v519_v54 = vmul.f32 %v2717_v53, %v2713_v45  ;;  %2501 = vmatprep.subr.bf16.mxu1 %v2791_v6 }
 0x5cf   :  { %v620_v62 = vpop.permute.xlu0 %619 }
 0x5d0   :  { %v521_v56 = vpack.c.bf16 %v519_v54, %v519_v54 }
 0x5d2   :  { %2486 = vmatmul.mubr.msk.bf16.vlgmr.msra.gmra.mxu0 %vm128_vm7, %v521_v56 }
 0x5d3   :  { %2496 = vmatpush3.bf16.xpose.msra.mxu0 %v627_v57  ;;  %2497 = vmatprep.mubr.msk.bf16.mxu0 %vm2792_vm0, %v2791_v6 }
 0x5d4   :  { %2507 = vmatprep.subr.bf16.mxu0 %v2791_v6 }
 0x5d5   :  { %v2719_v58 = vpop.eup %2718 }
 0x5d6   :  { %v520_v59 = vmul.f32 %v2719_v58, %v2715_v47 }
 0x5d8   :  { %v522_v61 = vpack.c.bf16 %v520_v59, %v520_v59 }
 0x5da   :  { %2492 = vmatmul.mubr.msk.bf16.vlgmr.msra.gmra.mxu1 %vm128_vm7, %v522_v61  ;;  %2498 = vmatmul.mubr.msk.bf16.vlgmr.msra.gmra.mxu0 %vm403_vm9, %v620_v62 }
 0x5db   :  { %2502 = vmatpush3.bf16.xpose.msra.mxu1 %v677_v63  ;;  %2503 = vmatprep.mubr.msk.bf16.mxu1 %vm2792_vm0, %v2791_v6 }
 0x5dc   :  { %2513 = vmatprep.subr.bf16.mxu1 %v2791_v6  ;;  %2509 = vmatprep.mubr.msk.bf16.mxu0 %vm2792_vm0, %v2791_v6 }
 0x5e2   :  { %2504 = vmatmul.mubr.msk.bf16.vlgmr.msra.gmra.mxu1 %vm403_vm9, %v670_v0 }
 0x5e3   :  { %2515 = vmatprep.mubr.msk.bf16.mxu1 %vm2792_vm0, %v2791_v6 }
 0x692   :  { %v3099_v1 = vpop.f32.mrf.mxu0 }
 0x694   :  { %v2487_v2 = vpop.f32.mrf.mxu0 }
 0x696   :  { %v568_v3 = vpop.f32.mrf.mxu0 }
 0x698   :  { %v2488_v7 = vpop.f32.mrf.mxu0 }
 0x699   :  { %v2272_v7 = vld [vmem:[%s3422_s11] ss:$0 sm:$0xff] }
 0x69a   :  { %v3101_v8 = vpop.f32.mrf.mxu1  ;;  %v663_v9 = vpop.f32.mrf.mxu0 }
 0x69b   :  { %v664_v10 = vadd.f32 %v3054_v23, %v663_v9 }
 0x69c   :  { %v2493_v11 = vpop.f32.mrf.mxu1  ;;  %v2499_v13 = vpop.f32.mrf.mxu0 }
 0x69d   :  { %v719_v14 = vsel %vm128_vm7, %v664_v10, -inf }
 0x69e   :  { %720 = vmax.xlane.f32.xlu0 %v719_v14  ;;  %v616_v15 = vpop.f32.mrf.mxu1  ;;  %v666_v19 = vpop.f32.mrf.mxu0 }
 0x6a0   :  { %v2494_v20 = vpop.f32.mrf.mxu1  ;;  %v2500_v21 = vpop.f32.mrf.mxu0 }
 0x6a2   :  { %v713_v22 = vpop.f32.mrf.mxu1 }
 0x6a3   :  { %v714_v24 = vadd.f32 %v3061_v30, %v713_v22 }
 0x6a4   :  { %v2505_v25 = vpop.f32.mrf.mxu1 }
 0x6a5   :  { %v722_v26 = vsel %vm128_vm7, %v714_v24, -inf }
 0x6a6   :  { %723 = vmax.xlane.f32.xlu1 %v722_v26  ;;  %v716_v27 = vpop.f32.mrf.mxu1 }
 0x6a8   :  { %v2506_v28 = vpop.f32.mrf.mxu1 }
 0x6b7   :  { %743 = vrot.lane.b32.xlu1 %v3031_v12, %s2798_s3 }
 0x727   :  { %v721_v29 = vpop.xlane.xlu0 %720 }
 0x728   :  { %v725_v31 = vsub.f32 %v664_v10, %v721_v29 }
 0x72a   :  { %v727_v32 = vmul.f32 1.442695, %v725_v31 }
 0x72c   :  { %2720 = vpow2.f32 %v727_v32  ;;  %v2689_v32 = vld [vmem:[%s3425_s14] sm:$0xff]  }
 0x72f   :  { %v724_v33 = vpop.xlane.xlu1 %723 }
 0x730   :  { %v726_v34 = vsub.f32 %v714_v24, %v724_v33 }
 0x732   :  { %v729_v35 = vmul.f32 1.442695, %v726_v34 }
 0x733   :  { %v744_v36 = vpop.permute.xlu1 %743 }
 0x734   :  { %2722 = vpow2.f32 %v729_v35  ;;  %v749_v37 = vsel %vm132_vm1, %v744_v36, 0 }
 0x735   :  { %2508 = vmatpush3.bf16.msra.mxu0 %v749_v37 }
 0x736   :  { %2519 = vmatprep.subr.bf16.mxu0 %v2791_v6 }
 0x739   :  { %v2721_v38 = vpop.eup %2720 }
 0x73a   :  { %v731_v39 = vsel %vm128_vm7, %v2721_v38, 0.0 }
 0x73b   :  { %732 = vadd.xlane.f32.xlu0 %v731_v39 }
 0x741   :  { %v2723_v40 = vpop.eup %2722 }
 0x742   :  { %v734_v12 = vsel %vm128_vm7, %v2723_v40, 0.0 }
 0x743   :  { %735 = vadd.xlane.f32.xlu0 %v734_v12  ;;  %v2276_v12 = vld [vmem:[%s3423_s12] ss:$0 sm:$0xff] }
 0x759   :  { %791 = vrot.lane.b32.xlu0 %v3035_v18, %s2798_s3 }
 0x7c4   :  { %v733_v41 = vpop.xlane.xlu0 %732 }
 0x7c5   :  { %2724 = vrcp.f32 %v733_v41 }
 0x7cc   :  { %v736_v42 = vpop.xlane.xlu0 %735 }
 0x7cd   :  { %2726 = vrcp.f32 %v736_v42 }
 0x7d0   :  { %v792_v43 = vpop.permute.xlu0 %791 }
 0x7d1   :  { %v797_v44 = vsel %vm132_vm1, %v792_v43, 0 }
 0x7d2   :  { %v2725_v45 = vpop.eup %2724  ;;  %2514 = vmatpush3.bf16.msra.mxu1 %v797_v44  ;;  %v2277_v44 = vld [vmem:[%s3424_s13] ss:$0 sm:$0xff] }
 0x7d3   :  { %v739_v46 = vmul.f32 %v2725_v45, %v2721_v38  ;;  %2527 = vmatprep.subr.bf16.mxu1 %v2791_v6 }
 0x7d5   :  { %v741_v47 = vpack.c.bf16 %v739_v46, %v739_v46 }
 0x7d7   :  { %2510 = vmatmul.mubr.msk.bf16.vlgmr.msra.gmra.mxu0 %vm128_vm7, %v741_v47 }
 0x7d8   :  { %2523 = vmatprep.mubr.msk.bf16.mxu0 %vm2792_vm0, %v2791_v6  ;;  %2520 = vmatpush3.bf16.msra.mxu0 %v2686_v50  ;;  %v2692_v50 = vld [vmem:[%s3427_s16 + $0x8] sm:$0xff]  }
 0x7d9   :  { %2521 = vmatprep.subr.bf16.mxu0 %v2791_v6 }
 0x7da   :  { %v2727_v48 = vpop.eup %2726 }
 0x7db   :  { %v740_v18 = vmul.f32 %v2727_v48, %v2723_v40 }
 0x7dc   :  { %2522 = vmatpush3.bf16.msra.mxu0 %v2687_v51  ;;  %v2693_v51 = vld [vmem:[%s3427_s16] sm:$0xff]  }
 0x7dd   :  { %v742_v49 = vpack.c.bf16 %v740_v18, %v740_v18  ;;  %2535 = vmatprep.subr.bf16.mxu0 %v2791_v6  ;;  %v2690_v18 = vld [vmem:[%s3427_s16 + $0x18] sm:$0xff]  }
 0x7df   :  { %2516 = vmatmul.mubr.msk.bf16.vlgmr.msra.gmra.mxu1 %vm128_vm7, %v742_v49  ;;  %v2691_v49 = vld [vmem:[%s3427_s16 + $0x10] sm:$0xff]  }
 0x7e0   :  { %2531 = vmatprep.mubr.msk.bf16.mxu1 %vm2792_vm0, %v2791_v6 }
 0x897   :  { %v785_v52 = vpop.f32.mrf.mxu0 }
 0x899   :  { %v2511_v53 = vpop.f32.mrf.mxu0 }
 0x89b   :  { %v788_v54 = vpop.f32.mrf.mxu0 }
 0x89d   :  { %v2512_v55 = vpop.f32.mrf.mxu0 }
 0x89f   :  { %v833_v56 = vpop.f32.mrf.mxu1 }
 0x8a0   :  { %v2666_v57 = vpack.i.bf16 %v833_v56, %v785_v52  ;;  %v2278_v52 = vld [vmem:[%s3426_s15] ss:$0 sm:$0xff] }
 0x8a1   :  { %v2517_v58 = vpop.f32.mrf.mxu1 }
 0x8a2   :  { %2667 = vrot.lane.b32.xlu1 %v2666_v57, %s2799_s19 }
 0x8a3   :  { %v836_v59 = vpop.f32.mrf.mxu1 }
 0x8a5   :  { %v2518_v60 = vpop.f32.mrf.mxu1 }
 0x914   :  { %v2668_v61 = vpop.permute.xlu1 %2667 }
 0x915   :  { %v2670_v62 = vunpack.i.h.bf16 %v2668_v61  ;;  %v2669_v63 = vunpack.i.l.bf16 %v2668_v61 }
 0x917   :  { %v848_v0 = vsel %vm403_vm9, %v3101_v8, %v2670_v62  ;;  %v847_v2 = vsel %vm403_vm9, %v3099_v1, %v2669_v63 }
 0x918   :  { %v853_v3 = vpack.c.bf16 %v848_v0, %v847_v2 }
 0x91a   :  { %2524 = vmatmul.mubr.msk.bf16.vlgmr.msra.gmra.mxu0 %vm272_vm8, %v853_v3 }
 0x91b   :  { %2543 = vmatprep.mubr.msk.bf16.mxu0 %vm2792_vm0, %v2791_v6  ;;  %2536 = vmatpush3.bf16.msra.mxu0 %v2690_v18 }
 0x91c   :  { %2537 = vmatprep.subr.bf16.mxu0 %v2791_v6 }
 0x91f   :  { %2538 = vmatpush3.bf16.msra.mxu0 %v2691_v49 }
 0x920   :  { %2539 = vmatprep.subr.bf16.mxu0 %v2791_v6 }
 0x923   :  { %2540 = vmatpush3.bf16.msra.mxu0 %v2692_v50  ;;  %v2288_v50 = vld [vmem:[%s3429_s18] ss:$0 sm:$0xff] }
 0x924   :  { %2541 = vmatprep.subr.bf16.mxu0 %v2791_v6 }
 0x927   :  { %2542 = vmatpush3.bf16.msra.mxu0 %v2693_v51 }
 0x928   :  { %2561 = vmatprep.subr.bf16.mxu0 %v2791_v6 }
 0x9da   :  { %v910_v9 = vpop.f32.mrf.mxu0 }
 0x9db   :  { %v911_v10 = vadd.f32 %v2272_v7, %v910_v9 }
 0x9dc   :  { %v2525_v11 = vpop.f32.mrf.mxu0 }
 0x9dd   :  { %v917_v13 = vadd.f32 %v911_v10, %v3019_v4 }
 0x9de   :  { %v913_v14 = vpop.f32.mrf.mxu0 }
 0x9df   :  { %v914_v8 = vadd.f32 %v2272_v7, %v913_v14  ;;  %v921_v15 = vsel %vm272_vm8, %v917_v13, 0.0 }
 0x9e0   :  { %922 = vadd.xlane.f32.xlu1 %v921_v15  ;;  %v2526_v1 = vpop.f32.mrf.mxu0 }
 0x9e1   :  { %v918_v19 = vadd.f32 %v914_v8, %v3021_v5  ;;  %v2688_v5 = vld [vmem:[%s3425_s14 + $0x8] sm:$0xff]  }
 0x9e2   :  { %2528 = vmatpush3.bf16.msra.mxu1 %v2688_v5 }
 0x9e3   :  { %v924_v20 = vsel %vm272_vm8, %v918_v19, 0.0  ;;  %2529 = vmatprep.subr.bf16.mxu1 %v2791_v6 }
 0x9e4   :  { %925 = vadd.xlane.f32.xlu0 %v924_v20 }
 0x9e6   :  { %2530 = vmatpush3.bf16.msra.mxu1 %v2689_v32 }
 0x9e7   :  { %2547 = vmatprep.subr.bf16.mxu1 %v2791_v6 }
 0xa69   :  { %v923_v21 = vpop.xlane.xlu1 %922 }
 0xa6a   :  { %v927_v22 = vmul.f32 0.03125, %v923_v21  ;;  %v2282_v21 = vld [vmem:[%s3428_s17] ss:$0 sm:$0xff] }
 0xa6c   :  { %v929_v24 = vsub.f32 %v917_v13, %v927_v22 }
 0xa6d   :  { %v926_v25 = vpop.xlane.xlu0 %925 }
 0xa6e   :  { %v928_v26 = vmul.f32 0.03125, %v926_v25  ;;  %v931_v27 = vmul.f32 %v929_v24, %v929_v24 }
 0xa70   :  { %v930_v28 = vsub.f32 %v918_v19, %v928_v26  ;;  %v933_v4 = vsel %vm272_vm8, %v931_v27, 0.0 }
 0xa71   :  { %934 = vadd.xlane.f32.xlu0 %v933_v4 }
 0xa72   :  { %v932_v29 = vmul.f32 %v930_v28, %v930_v28 }
 0xa74   :  { %v936_v31 = vsel %vm272_vm8, %v932_v29, 0.0 }
 0xa75   :  { %937 = vadd.xlane.f32.xlu1 %v936_v31 }
 0xafa   :  { %v935_v33 = vpop.xlane.xlu0 %934 }
 0xafb   :  { %v939_v34 = vmul.f32 0.03125, %v935_v33 }
 0xafd   :  { %v941_v35 = vadd.f32 1e-12, %v939_v34 }
 0xafe   :  { %v938_v36 = vpop.xlane.xlu1 %937 }
 0xaff   :  { %2728 = vrsqrt.f32 %v941_v35  ;;  %v940_v37 = vmul.f32 0.03125, %v938_v36 }
 0xb01   :  { %v942_v38 = vadd.f32 1e-12, %v940_v37 }
 0xb03   :  { %2730 = vrsqrt.f32 %v942_v38 }
 0xb0c   :  { %v2729_v39 = vpop.eup %2728 }
 0xb0d   :  { %v945_v40 = vmul.f32 %v2729_v39, %v929_v24 }
 0xb0f   :  { %v953_v43 = vmul.f32 %v2276_v12, %v945_v40 }
 0xb10   :  { %v2731_v41 = vpop.eup %2730 }
 0xb11   :  { %v946_v42 = vmul.f32 %v2731_v41, %v930_v28  ;;  %v961_v46 = vadd.f32 %v2277_v44, %v953_v43  ;;  %v2694_v41 = vld [vmem:[%s3458_s6 + $0x18] sm:$0xff]  }
 0xb13   :  { %v954_v45 = vmul.f32 %v2276_v12, %v946_v42  ;;  %v2695_v42 = vld [vmem:[%s3458_s6 + $0x10] sm:$0xff]   ;;  %s2800_s6 = smov [#allocation2]  }
 0xb15   :  { %v962_v47 = vadd.f32 %v2277_v44, %v954_v45 }
 0xb17   :  { %v967_v48 = vpack.c.bf16 %v962_v47, %v961_v46 }
 0xb19   :  { %2532 = vmatmul.mubr.msk.bf16.vlgmr.msra.gmra.mxu1 %vm272_vm8, %v967_v48 }
 0xb1a   :  { %2551 = vmatprep.mubr.msk.bf16.mxu1 %vm2792_vm0, %v2791_v6  ;;  %2548 = vmatpush3.bf16.msra.mxu1 %v2694_v41 }
 0xb1b   :  { %2549 = vmatprep.subr.bf16.mxu1 %v2791_v6 }
 0xb1e   :  { %2550 = vmatpush3.bf16.msra.mxu1 %v2695_v42 }
 0xb1f   :  { %2555 = vmatprep.subr.bf16.mxu1 %v2791_v6 }
 0xbd9   :  { %v1024_v53 = vpop.f32.mrf.mxu1 }
 0xbda   :  { %v1025_v54 = vadd.f32 %v2278_v52, %v1024_v53 }
 0xbdb   :  { %v2533_v55 = vpop.f32.mrf.mxu1 }
 0xbdc   :  { %v1031_v56 = vmul.f32 %v1025_v54, %v1025_v54 }
 0xbdd   :  { %v1027_v57 = vpop.f32.mrf.mxu1 }
 0xbde   :  { %v1033_v58 = vmul.f32 %v1031_v56, %v1025_v54  ;;  %v1028_v59 = vadd.f32 %v2278_v52, %v1027_v57 }
 0xbdf   :  { %v2534_v60 = vpop.f32.mrf.mxu1 }
 0xbe0   :  { %v1035_v61 = vmul.f32 0.044715, %v1033_v58  ;;  %v1032_v62 = vmul.f32 %v1028_v59, %v1028_v59 }
 0xbe2   :  { %v1037_v63 = vadd.f32 %v1035_v61, %v1025_v54  ;;  %v1034_v0 = vmul.f32 %v1032_v62, %v1028_v59 }
 0xbe4   :  { %v1039_v2 = vmul.f32 0.7978846, %v1037_v63  ;;  %v1036_v3 = vmul.f32 0.044715, %v1034_v0 }
 0xbe6   :  { %2732 = vtanh.f32 %v1039_v2  ;;  %v1038_v7 = vadd.f32 %v1036_v3, %v1028_v59 }
 0xbe8   :  { %v1040_v9 = vmul.f32 0.7978846, %v1038_v7 }
 0xbea   :  { %2734 = vtanh.f32 %v1040_v9 }
 0xbf3   :  { %v2733_v10 = vpop.eup %2732 }
 0xbf4   :  { %v1043_v11 = vadd.f32 1.0, %v2733_v10 }
 0xbf6   :  { %v1045_v14 = vmul.f32 0.5, %v1043_v11 }
 0xbf7   :  { %v2735_v13 = vpop.eup %2734 }
 0xbf8   :  { %v1044_v8 = vadd.f32 1.0, %v2735_v13  ;;  %v1047_v1 = vmul.f32 %v1045_v14, %v1025_v54  ;;  %v2289_v54 = vld [vmem:[%s3462_s27] ss:$0 sm:$0xff] }
 0xbfa   :  { %v1046_v15 = vmul.f32 0.5, %v1044_v8 }
 0xbfc   :  { %v1048_v19 = vmul.f32 %v1046_v15, %v1028_v59  ;;  %v2295_v59 = vld [vmem:[%s3420_s9 + $0x1] ss:$0 sm:$0xff] }
 0xbfe   :  { %v1057_v20 = vpack.c.bf16 %v1048_v19, %v1047_v1 }
 0xc00   :  { %2544 = vmatmul.mubr.msk.bf16.vlgmr.msra.gmra.mxu0 %vm1089_vm10, %v1057_v20 }
 0xc01   :  { %2563 = vmatprep.mubr.msk.bf16.mxu0 %vm2792_vm0, %v2791_v6 }
 0xcc0   :  { %v1127_v22 = vpop.f32.mrf.mxu0 }
 0xcc1   :  { %v1128_v24 = vadd.f32 %v2282_v21, %v1127_v22 }
 0xcc2   :  { %v2545_v25 = vpop.f32.mrf.mxu0 }
 0xcc3   :  { %v1134_v26 = vadd.f32 %v1128_v24, %v961_v46 }
 0xcc4   :  { %v1130_v27 = vpop.f32.mrf.mxu0 }
 0xcc5   :  { %v1131_v28 = vadd.f32 %v2282_v21, %v1130_v27  ;;  %v1138_v4 = vsel %vm272_vm8, %v1134_v26, 0.0 }
 0xcc6   :  { %1139 = vadd.xlane.f32.xlu0 %v1138_v4  ;;  %v2546_v29 = vpop.f32.mrf.mxu0 }
 0xcc7   :  { %v1135_v31 = vadd.f32 %v1131_v28, %v962_v47 }
 0xcc9   :  { %v1141_v5 = vsel %vm272_vm8, %v1135_v31, 0.0 }
 0xcca   :  { %1142 = vadd.xlane.f32.xlu1 %v1141_v5 }
 0xd4f   :  { %v1140_v32 = vpop.xlane.xlu0 %1139 }
 0xd50   :  { %v1144_v33 = vmul.f32 0.03125, %v1140_v32 }
 0xd52   :  { %v1146_v34 = vsub.f32 %v1134_v26, %v1144_v33 }
 0xd53   :  { %v1143_v35 = vpop.xlane.xlu1 %1142 }
 0xd54   :  { %v1145_v36 = vmul.f32 0.03125, %v1143_v35  ;;  %v1148_v37 = vmul.f32 %v1146_v34, %v1146_v34 }
 0xd56   :  { %v1147_v38 = vsub.f32 %v1135_v31, %v1145_v36  ;;  %v1150_v39 = vsel %vm272_vm8, %v1148_v37, 0.0 }
 0xd57   :  { %1151 = vadd.xlane.f32.xlu0 %v1150_v39 }
 0xd58   :  { %v1149_v40 = vmul.f32 %v1147_v38, %v1147_v38 }
 0xd5a   :  { %v1153_v12 = vsel %vm272_vm8, %v1149_v40, 0.0 }
 0xd5b   :  { %1154 = vadd.xlane.f32.xlu1 %v1153_v12 }
 0xde0   :  { %v1152_v43 = vpop.xlane.xlu0 %1151 }
 0xde1   :  { %v1156_v44 = vmul.f32 0.03125, %v1152_v43 }
 0xde3   :  { %v1158_v45 = vadd.f32 1e-12, %v1156_v44 }
 0xde4   :  { %v1155_v46 = vpop.xlane.xlu1 %1154 }
 0xde5   :  { %2736 = vrsqrt.f32 %v1158_v45  ;;  %v1157_v47 = vmul.f32 0.03125, %v1155_v46 }
 0xde7   :  { %v1159_v48 = vadd.f32 1e-12, %v1157_v47 }
 0xde9   :  { %2738 = vrsqrt.f32 %v1159_v48 }
 0xdf2   :  { %v2737_v18 = vpop.eup %2736 }
 0xdf3   :  { %v1162_v49 = vmul.f32 %v2737_v18, %v1146_v34 }
 0xdf5   :  { %v1170_v53 = vmul.f32 %v2288_v50, %v1162_v49 }
 0xdf6   :  { %v2739_v51 = vpop.eup %2738 }
 0xdf7   :  { %v1163_v52 = vmul.f32 %v2739_v51, %v1147_v38  ;;  %v3208_v56 = vadd.f32 %v2289_v54, %v1170_v53 }
 0xdf9   :  { %v1171_v55 = vmul.f32 %v2288_v50, %v1163_v52 }
 0xdfb   :  { %v3210_v57 = vadd.f32 %v2289_v54, %v1171_v55 }
 0xdfd   :  { %v1185_v58 = vpack.c.bf16 %v3210_v57, %v3208_v56 }
 0xdff   :  { %2552 = vmatmul.mubr.msk.bf16.vlgmr.msra.gmra.mxu1 %vm272_vm8, %v1185_v58 }
 0xe00   :  { %2557 = vmatprep.mubr.msk.bf16.mxu1 %vm2792_vm0, %v2791_v6 }
 0xebf   :  { %v1243_v60 = vpop.f32.mrf.mxu1 }
 0xec0   :  { %v1244_v61 = vadd.f32 %v2295_v59, %v1243_v60 }
 0xec1   :  { %v2553_v62 = vpop.f32.mrf.mxu1 }
 0xec2   :  { %v3220_v63 = vpack.c.bf16 %v1244_v61, %v1244_v61 }
 0xec3   :  { %v1246_v0 = vpop.f32.mrf.mxu1 }
 0xec4   :  { %v1247_v2 = vadd.f32 %v2295_v59, %v1246_v0  ;;  %1253 = vrot.lane.b32.xlu0 %v3220_v63, %s2794_s1 }
 0xec5   :  { %v2554_v3 = vpop.f32.mrf.mxu1 }
 0xec6   :  { %v3224_v7 = vpack.c.bf16 %v1247_v2, %v1247_v2 }
 0xec8   :  { %1302 = vrot.lane.b32.xlu1 %v3224_v7, %s2794_s1 }
 0xf36   :  { %v1254_v9 = vpop.permute.xlu0 %1253 }
 0xf37   :  { %v1259_v10 = vsel %vm403_vm9, %v1254_v9, 0 }
 0xf38   :  { %2556 = vmatpush3.bf16.xpose.msra.mxu1 %v1259_v10 }
 0xf39   :  { %2567 = vmatprep.subr.bf16.mxu1 %v2791_v6 }
 0xf3a   :  { %v1303_v11 = vpop.permute.xlu1 %1302 }
 0xf3b   :  { %v1308_v13 = vsel %vm403_vm9, %v1303_v11, 0 }
 0xf3c   :  { %2562 = vmatpush3.bf16.xpose.msra.mxu0 %v1308_v13 }
 0xf3d   :  { %2573 = vmatprep.subr.bf16.mxu0 %v2791_v6 }
 0xf3f   :  { %2558 = vmatmul.mubr.msk.bf16.vlgmr.msra.gmra.mxu1 %vm403_vm9, %v3220_v63 }
 0xf40   :  { %2569 = vmatprep.mubr.msk.bf16.mxu1 %vm2792_vm0, %v2791_v6 }
 0xf43   :  { %2564 = vmatmul.mubr.msk.bf16.vlgmr.msra.gmra.mxu0 %vm403_vm9, %v3224_v7 }
 0xf44   :  { %2575 = vmatprep.mubr.msk.bf16.mxu0 %vm2792_vm0, %v2791_v6 }
 0xfff   :  { %v1295_v14 = vpop.f32.mrf.mxu1 }
0x1000   :  { %v1296_v8 = vadd.f32 %v3054_v23, %v1295_v14 }
0x1001   :  { %v2559_v15 = vpop.f32.mrf.mxu1 }
0x1002   :  { %v1350_v1 = vsel %vm128_vm7, %v1296_v8, -inf }
0x1003   :  { %v1344_v19 = vpop.f32.mrf.mxu0  ;;  %1351 = vmax.xlane.f32.xlu1 %v1350_v1  ;;  %v1298_v20 = vpop.f32.mrf.mxu1 }
0x1004   :  { %v1345_v21 = vadd.f32 %v3061_v30, %v1344_v19 }
0x1005   :  { %v2560_v22 = vpop.f32.mrf.mxu1  ;;  %v2565_v24 = vpop.f32.mrf.mxu0 }
0x1006   :  { %v1353_v25 = vsel %vm128_vm7, %v1345_v21, -inf }
0x1007   :  { %1354 = vmax.xlane.f32.xlu0 %v1353_v25  ;;  %v1347_v26 = vpop.f32.mrf.mxu0 }
0x1009   :  { %v2566_v27 = vpop.f32.mrf.mxu0 }
0x1014   :  { %1422 = vrot.lane.b32.xlu1 %v3224_v7, %s2795_s29 }
0x101d   :  { %1374 = vrot.lane.b32.xlu0 %v3220_v63, %s2795_s29 }
0x108c   :  { %v1352_v28 = vpop.xlane.xlu1 %1351 }
0x108d   :  { %v1356_v4 = vsub.f32 %v1296_v8, %v1352_v28 }
0x108f   :  { %v1358_v29 = vmul.f32 1.442695, %v1356_v4 }
0x1090   :  { %v1355_v31 = vpop.xlane.xlu0 %1354  ;;  %v1423_v5 = vpop.permute.xlu1 %1422 }
0x1091   :  { %2740 = vpow2.f32 %v1358_v29  ;;  %v1357_v32 = vsub.f32 %v1345_v21, %v1355_v31  ;;  %v1428_v33 = vsel %vm132_vm1, %v1423_v5, 0 }
0x1092   :  { %2574 = vmatpush3.bf16.msra.mxu0 %v1428_v33 }
0x1093   :  { %v1360_v34 = vmul.f32 1.442695, %v1357_v32  ;;  %2585 = vmatprep.subr.bf16.mxu0 %v2791_v6 }
0x1094   :  { %v1375_v35 = vpop.permute.xlu0 %1374 }
0x1095   :  { %2742 = vpow2.f32 %v1360_v34  ;;  %v1380_v36 = vsel %vm132_vm1, %v1375_v35, 0 }
0x1096   :  { %2568 = vmatpush3.bf16.msra.mxu1 %v1380_v36 }
0x1097   :  { %2579 = vmatprep.subr.bf16.mxu1 %v2791_v6 }
0x109e   :  { %v2741_v37 = vpop.eup %2740 }
0x109f   :  { %v1362_v38 = vsel %vm128_vm7, %v2741_v37, 0.0 }
0x10a0   :  { %1363 = vadd.xlane.f32.xlu0 %v1362_v38  ;;  %v2696_v38 = vld [vmem:[%s3421_s10 + $0x18] sm:$0xff]  }
0x10a2   :  { %v2743_v39 = vpop.eup %2742 }
0x10a3   :  { %v1365_v40 = vsel %vm128_vm7, %v2743_v39, 0.0 }
0x10a4   :  { %1366 = vadd.xlane.f32.xlu1 %v1365_v40 }
0x10b5   :  { %1472 = vrot.lane.b32.xlu1 %v3220_v63, %s2796_s0 }
0x10b6   :  { %1522 = vrot.lane.b32.xlu0 %v3224_v7, %s2796_s0 }
0x10b9   :  { %1470 = vrot.lane.b32.xlu1 %v3220_v63, %s2797_s7 }
0x10ba   :  { %1520 = vrot.lane.b32.xlu0 %v3224_v7, %s2797_s7 }
0x1129   :  { %v1364_v12 = vpop.xlane.xlu0 %1363 }
0x112a   :  { %2744 = vrcp.f32 %v1364_v12 }
0x112d   :  { %v1367_v41 = vpop.xlane.xlu1 %1366  ;;  %v1523_v18 = vpop.permute.xlu0 %1522 }
0x112e   :  { %2746 = vrcp.f32 %v1367_v41  ;;  %v1528_v50 = vsel %vm403_vm9, %v1523_v18, 0 }
0x1131   :  { %v1473_v44 = vpop.permute.xlu1 %1472  ;;  %v1521_v52 = vpop.permute.xlu0 %1520 }
0x1132   :  { %v1478_v47 = vsel %vm403_vm9, %v1473_v44, 0 }
0x1135   :  { %v1471_v51 = vpop.permute.xlu1 %1470 }
0x1137   :  { %v2745_v42 = vpop.eup %2744 }
0x1138   :  { %v1370_v43 = vmul.f32 %v2745_v42, %v2741_v37 }
0x113a   :  { %v1372_v45 = vpack.c.bf16 %v1370_v43, %v1370_v43 }
0x113b   :  { %v2747_v46 = vpop.eup %2746 }
0x113c   :  { %2570 = vmatmul.mubr.msk.bf16.vlgmr.msra.gmra.mxu1 %vm128_vm7, %v1372_v45  ;;  %v1371_v48 = vmul.f32 %v2747_v46, %v2743_v39  ;;  %v2697_v39 = vld [vmem:[%s3421_s10 + $0x10] sm:$0xff]  }
0x113d   :  { %2580 = vmatpush3.bf16.xpose.msra.mxu1 %v1478_v47  ;;  %2581 = vmatprep.mubr.msk.bf16.mxu1 %vm2792_vm0, %v2791_v6 }
0x113e   :  { %v1373_v49 = vpack.c.bf16 %v1371_v48, %v1371_v48  ;;  %2591 = vmatprep.subr.bf16.mxu1 %v2791_v6 }
0x1140   :  { %2576 = vmatmul.mubr.msk.bf16.vlgmr.msra.gmra.mxu0 %vm128_vm7, %v1373_v49 }
0x1141   :  { %2586 = vmatpush3.bf16.xpose.msra.mxu0 %v1528_v50  ;;  %2587 = vmatprep.mubr.msk.bf16.mxu0 %vm2792_vm0, %v2791_v6 }
0x1142   :  { %2597 = vmatprep.subr.bf16.mxu0 %v2791_v6 }
0x1144   :  { %2582 = vmatmul.mubr.msk.bf16.vlgmr.msra.gmra.mxu1 %vm403_vm9, %v1471_v51 }
0x1145   :  { %2593 = vmatprep.mubr.msk.bf16.mxu1 %vm2792_vm0, %v2791_v6 }
0x1148   :  { %2588 = vmatmul.mubr.msk.bf16.vlgmr.msra.gmra.mxu0 %vm403_vm9, %v1521_v52 }
0x1149   :  { %2599 = vmatprep.mubr.msk.bf16.mxu0 %vm2792_vm0, %v2791_v6 }
0x11fc   :  { %v3278_v53 = vpop.f32.mrf.mxu1 }
0x11fe   :  { %v2571_v54 = vpop.f32.mrf.mxu1 }
0x11ff   :  { %v2312_v54 = vld [vmem:[%s3422_s11 + $0x1] ss:$0 sm:$0xff] }
0x1200   :  { %v1419_v55 = vpop.f32.mrf.mxu1  ;;  %v3280_v58 = vpop.f32.mrf.mxu0 }
0x1202   :  { %v2572_v59 = vpop.f32.mrf.mxu1  ;;  %v2577_v60 = vpop.f32.mrf.mxu0 }
0x1204   :  { %v1467_v61 = vpop.f32.mrf.mxu0  ;;  %v1514_v62 = vpop.f32.mrf.mxu1 }
0x1205   :  { %v1515_v0 = vadd.f32 %v3054_v23, %v1514_v62 }
0x1206   :  { %v2578_v2 = vpop.f32.mrf.mxu0  ;;  %v2583_v3 = vpop.f32.mrf.mxu1 }
0x1207   :  { %v1570_v9 = vsel %vm128_vm7, %v1515_v0, -inf }
0x1208   :  { %v1564_v10 = vpop.f32.mrf.mxu0  ;;  %1571 = vmax.xlane.f32.xlu1 %v1570_v9  ;;  %v1517_v11 = vpop.f32.mrf.mxu1 }
0x1209   :  { %v1565_v13 = vadd.f32 %v3061_v30, %v1564_v10 }
0x120a   :  { %v2584_v14 = vpop.f32.mrf.mxu1  ;;  %v2589_v8 = vpop.f32.mrf.mxu0 }
0x120b   :  { %v1573_v15 = vsel %vm128_vm7, %v1565_v13, -inf }
0x120c   :  { %1574 = vmax.xlane.f32.xlu0 %v1573_v15  ;;  %v1567_v1 = vpop.f32.mrf.mxu0 }
0x120e   :  { %v2590_v19 = vpop.f32.mrf.mxu0 }
0x1291   :  { %v1572_v20 = vpop.xlane.xlu1 %1571 }
0x1292   :  { %v1576_v21 = vsub.f32 %v1515_v0, %v1572_v20  ;;  %v2699_v20 = vld [vmem:[%s3425_s14 + $0x10] sm:$0xff]  }
0x1294   :  { %v1578_v22 = vmul.f32 1.442695, %v1576_v21 }
0x1295   :  { %v1575_v23 = vpop.xlane.xlu0 %1574 }
0x1296   :  { %2748 = vpow2.f32 %v1578_v22  ;;  %v1577_v24 = vsub.f32 %v1565_v13, %v1575_v23 }
0x1298   :  { %v1580_v25 = vmul.f32 1.442695, %v1577_v24 }
0x129a   :  { %2750 = vpow2.f32 %v1580_v25 }
0x12a3   :  { %v2749_v26 = vpop.eup %2748 }
0x12a4   :  { %v1582_v27 = vsel %vm128_vm7, %v2749_v26, 0.0 }
0x12a5   :  { %1583 = vadd.xlane.f32.xlu0 %v1582_v27 }
0x12a7   :  { %v2751_v30 = vpop.eup %2750 }
0x12a8   :  { %v1585_v28 = vsel %vm128_vm7, %v2751_v30, 0.0 }
0x12a9   :  { %1586 = vadd.xlane.f32.xlu1 %v1585_v28  ;;  %v2318_v28 = vld [vmem:[%s3423_s12 + $0x1] ss:$0 sm:$0xff]  ;;  %s2233_s12 = sshll.u32 %s2800_s6, 4  ;;  %s2234_s12 = int_to_ptr.vmem [resolvable:$true] %s2233_s12 }
0x12aa   :  { %p2773_p1 = scmp.lt.s32.totalorder %s2234_s12, %s2234_s12 }
0x12ba   :  { %1642 = vrot.lane.b32.xlu1 %v3224_v7, %s2798_s3 }
0x12bb   :  { %1594 = vrot.lane.b32.xlu0 %v3220_v63, %s2798_s3 }
0x132e   :  { %v1584_v4 = vpop.xlane.xlu0 %1583 }
0x132f   :  { %2752 = vrcp.f32 %v1584_v4 }
0x1332   :  { %v1595_v29 = vpop.permute.xlu0 %1594  ;;  %v1587_v31 = vpop.xlane.xlu1 %1586 }
0x1333   :  { %v1600_v5 = vsel %vm132_vm1, %v1595_v29, 0  ;;  %2754 = vrcp.f32 %v1587_v31 }
0x1334   :  { %2592 = vmatpush3.bf16.msra.mxu1 %v1600_v5  ;;  %v2319_v5 = vld [vmem:[%s3424_s13 + $0x1] ss:$0 sm:$0xff] }
0x1335   :  { %2603 = vmatprep.subr.bf16.mxu1 %v2791_v6 }
0x1336   :  { %v1643_v32 = vpop.permute.xlu1 %1642 }
0x1337   :  { %v1648_v33 = vsel %vm132_vm1, %v1643_v32, 0 }
0x1338   :  { %2598 = vmatpush3.bf16.msra.mxu0 %v1648_v33 }
0x1339   :  { %2611 = vmatprep.subr.bf16.mxu0 %v2791_v6 }
0x133c   :  { %v2753_v7 = vpop.eup %2752 }
0x133d   :  { %v1590_v34 = vmul.f32 %v2753_v7, %v2749_v26 }
0x133f   :  { %v1592_v35 = vpack.c.bf16 %v1590_v34, %v1590_v34 }
0x1340   :  { %v2755_v63 = vpop.eup %2754 }
0x1341   :  { %2594 = vmatmul.mubr.msk.bf16.vlgmr.msra.gmra.mxu1 %vm128_vm7, %v1592_v35  ;;  %v1591_v36 = vmul.f32 %v2755_v63, %v2751_v30  ;;  %v2700_v35 = vld [vmem:[%s3427_s16 + $0x38] sm:$0xff]   ;;  %v2701_v63 = vld [vmem:[%s3427_s16 + $0x30] sm:$0xff]  }
0x1342   :  { %2607 = vmatprep.mubr.msk.bf16.mxu1 %vm2792_vm0, %v2791_v6  ;;  %2604 = vmatpush3.bf16.msra.mxu1 %v2696_v38  ;;  %v2325_v38 = vld [vmem:[%s3426_s15 + $0x1] ss:$0 sm:$0xff] }
0x1343   :  { %v1593_v37 = vpack.c.bf16 %v1591_v36, %v1591_v36  ;;  %2605 = vmatprep.subr.bf16.mxu1 %v2791_v6  ;;  %v2702_v36 = vld [vmem:[%s3427_s16 + $0x28] sm:$0xff]  }
0x1345   :  { %2600 = vmatmul.mubr.msk.bf16.vlgmr.msra.gmra.mxu0 %vm128_vm7, %v1593_v37  ;;  %v2703_v37 = vld [vmem:[%s3427_s16 + $0x20] sm:$0xff]  }
0x1346   :  { %2615 = vmatprep.mubr.msk.bf16.mxu0 %vm2792_vm0, %v2791_v6  ;;  %2606 = vmatpush3.bf16.msra.mxu1 %v2697_v39 }
0x1347   :  { %2619 = vmatprep.subr.bf16.mxu1 %v2791_v6 }
0x1401   :  { %v1636_v40 = vpop.f32.mrf.mxu1 }
0x1403   :  { %v2595_v12 = vpop.f32.mrf.mxu1 }
0x1405   :  { %v1639_v41 = vpop.f32.mrf.mxu1  ;;  %v1684_v42 = vpop.f32.mrf.mxu0 }
0x1406   :  { %v2671_v43 = vpack.i.bf16 %v1684_v42, %v1636_v40 }
0x1407   :  { %v2596_v44 = vpop.f32.mrf.mxu1  ;;  %v2601_v45 = vpop.f32.mrf.mxu0 }
0x1408   :  { %2672 = vrot.lane.b32.xlu1 %v2671_v43, %s2799_s19 }
0x1409   :  { %v1687_v46 = vpop.f32.mrf.mxu0 }
0x140b   :  { %v2602_v47 = vpop.f32.mrf.mxu0 }
0x147a   :  { %v2673_v48 = vpop.permute.xlu1 %2672 }
0x147b   :  { %v2675_v18 = vunpack.i.h.bf16 %v2673_v48  ;;  %v2674_v49 = vunpack.i.l.bf16 %v2673_v48 }
0x147d   :  { %v1699_v50 = vsel %vm403_vm9, %v3280_v58, %v2675_v18  ;;  %v1698_v51 = vsel %vm403_vm9, %v3278_v53, %v2674_v49 }
0x147e   :  { %v1705_v52 = vpack.c.bf16 %v1699_v50, %v1698_v51 }
0x1480   :  { %2608 = vmatmul.mubr.msk.bf16.vlgmr.msra.gmra.mxu1 %vm272_vm8, %v1705_v52 }
0x1481   :  { %2627 = vmatprep.mubr.msk.bf16.mxu1 %vm2792_vm0, %v2791_v6  ;;  %2620 = vmatpush3.bf16.msra.mxu1 %v2700_v35 }
0x1482   :  { %2621 = vmatprep.subr.bf16.mxu1 %v2791_v6 }
0x1485   :  { %2622 = vmatpush3.bf16.msra.mxu1 %v2701_v63 }
0x1486   :  { %2623 = vmatprep.subr.bf16.mxu1 %v2791_v6 }
0x1489   :  { %2624 = vmatpush3.bf16.msra.mxu1 %v2702_v36 }
0x148a   :  { %2625 = vmatprep.subr.bf16.mxu1 %v2791_v6 }
0x148d   :  { %2626 = vmatpush3.bf16.msra.mxu1 %v2703_v37 }
0x148e   :  { %2645 = vmatprep.subr.bf16.mxu1 %v2791_v6 }
0x1540   :  { %v1763_v55 = vpop.f32.mrf.mxu1 }
0x1541   :  { %v1764_v59 = vadd.f32 %v2312_v54, %v1763_v55 }
0x1542   :  { %v2609_v60 = vpop.f32.mrf.mxu1 }
0x1543   :  { %v1770_v61 = vadd.f32 %v1764_v59, %v3208_v56 }
0x1544   :  { %v1766_v62 = vpop.f32.mrf.mxu1 }
0x1545   :  { %v1767_v58 = vadd.f32 %v2312_v54, %v1766_v62  ;;  %v1776_v0 = vsel %vm272_vm8, %v1770_v61, 0.0 }
0x1546   :  { %1777 = vadd.xlane.f32.xlu0 %v1776_v0  ;;  %v2610_v53 = vpop.f32.mrf.mxu1 }
0x1547   :  { %v1771_v2 = vadd.f32 %v1767_v58, %v3210_v57  ;;  %v2698_v57 = vld [vmem:[%s3425_s14 + $0x18] sm:$0xff]  }
0x1548   :  { %2612 = vmatpush3.bf16.msra.mxu0 %v2698_v57 }
0x1549   :  { %v1779_v3 = vsel %vm272_vm8, %v1771_v2, 0.0  ;;  %2613 = vmatprep.subr.bf16.mxu0 %v2791_v6 }
0x154a   :  { %1780 = vadd.xlane.f32.xlu1 %v1779_v3 }
0x154c   :  { %2614 = vmatpush3.bf16.msra.mxu0 %v2699_v20 }
0x154d   :  { %2631 = vmatprep.subr.bf16.mxu0 %v2791_v6 }
0x15cf   :  { %v1778_v9 = vpop.xlane.xlu0 %1777 }
0x15d0   :  { %v1782_v10 = vmul.f32 0.03125, %v1778_v9 }
0x15d2   :  { %v1784_v11 = vsub.f32 %v1770_v61, %v1782_v10 }
0x15d3   :  { %v1781_v13 = vpop.xlane.xlu1 %1780 }
0x15d4   :  { %v1783_v14 = vmul.f32 0.03125, %v1781_v13  ;;  %v1786_v8 = vmul.f32 %v1784_v11, %v1784_v11 }
0x15d6   :  { %v1785_v15 = vsub.f32 %v1771_v2, %v1783_v14  ;;  %v1788_v56 = vsel %vm272_vm8, %v1786_v8, 0.0  ;;  %v2338_v2 = vld [vmem:[%s3428_s17 + $0x1] ss:$0 sm:$0xff] }
0x15d7   :  { %1789 = vadd.xlane.f32.xlu0 %v1788_v56 }
0x15d8   :  { %v1787_v1 = vmul.f32 %v1785_v15, %v1785_v15 }
0x15da   :  { %v1791_v19 = vsel %vm272_vm8, %v1787_v1, 0.0 }
0x15db   :  { %1792 = vadd.xlane.f32.xlu0 %v1791_v19 }
0x1660   :  { %v1790_v21 = vpop.xlane.xlu0 %1789 }
0x1661   :  { %v1794_v22 = vmul.f32 0.03125, %v1790_v21 }
0x1663   :  { %v1796_v23 = vadd.f32 1e-12, %v1794_v22 }
0x1664   :  { %v1793_v24 = vpop.xlane.xlu0 %1792 }
0x1665   :  { %2756 = vrsqrt.f32 %v1796_v23  ;;  %v1795_v25 = vmul.f32 0.03125, %v1793_v24 }
0x1667   :  { %v1797_v26 = vadd.f32 1e-12, %v1795_v25 }
0x1669   :  { %2758 = vrsqrt.f32 %v1797_v26 }
0x1672   :  { %v2757_v27 = vpop.eup %2756 }
0x1673   :  { %v1800_v30 = vmul.f32 %v2757_v27, %v1784_v11 }
0x1675   :  { %v1808_v31 = vmul.f32 %v2318_v28, %v1800_v30 }
0x1676   :  { %v2759_v4 = vpop.eup %2758 }
0x1677   :  { %v1801_v29 = vmul.f32 %v2759_v4, %v1785_v15  ;;  %v1816_v33 = vadd.f32 %v2319_v5, %v1808_v31 }
0x1679   :  { %v1809_v32 = vmul.f32 %v2318_v28, %v1801_v29 }
0x167b   :  { %v1817_v7 = vadd.f32 %v2319_v5, %v1809_v32  ;;  %v2041_v32 = vshrl.u32 %v83_v16, 7 }
0x167d   :  { %v1823_v34 = vpack.c.bf16 %v1817_v7, %v1816_v33  ;;  %v2042_v35 = vmul.u32 8, %v2041_v32 }
0x167f   :  { %2616 = vmatmul.mubr.msk.bf16.vlgmr.msra.gmra.mxu0 %vm272_vm8, %v1823_v34  ;;  %v2346_v34 = vld [vmem:[%s3429_s18 + $0x1] ss:$0 sm:$0xff]  ;;  %vm2043_vm11 = vcmp.eq.s32.totalorder %v2982_v17, %v2042_v35 }
0x1680   :  { %2633 = vmatprep.mubr.msk.bf16.mxu0 %vm2792_vm0, %v2791_v6  ;;  %v2348_v16 = vsel %vm2043_vm11, 1.0, %v2791_v6  ;;  %v2705_v17 = vld [vmem:[%s3431_s20] sm:$0xff]  }
0x173f   :  { %v1881_v39 = vpop.f32.mrf.mxu0 }
0x1740   :  { %v1882_v40 = vadd.f32 %v2325_v38, %v1881_v39 }
0x1741   :  { %v2617_v12 = vpop.f32.mrf.mxu0 }
0x1742   :  { %v1888_v41 = vmul.f32 %v1882_v40, %v1882_v40 }
0x1743   :  { %v1884_v42 = vpop.f32.mrf.mxu0 }
0x1744   :  { %v1890_v43 = vmul.f32 %v1888_v41, %v1882_v40  ;;  %v1885_v44 = vadd.f32 %v2325_v38, %v1884_v42  ;;  %v2347_v38 = vld [vmem:[%s3462_s27 + $0x1] ss:$0 sm:$0xff]  ;;  %v2046_v42 = vpack.c.bf16 %v2348_v16, %v2348_v16 }
0x1745   :  { %v2618_v45 = vpop.f32.mrf.mxu0 }
0x1746   :  { %v1892_v46 = vmul.f32 0.044715, %v1890_v43  ;;  %v1889_v47 = vmul.f32 %v1885_v44, %v1885_v44  ;;  %v2704_v43 = vld [vmem:[%s3431_s20 + $0x8] sm:$0xff]  }
0x1748   :  { %v1894_v48 = vadd.f32 %v1892_v46, %v1882_v40  ;;  %v1891_v18 = vmul.f32 %v1889_v47, %v1885_v44 }
0x174a   :  { %v1896_v49 = vmul.f32 0.7978846, %v1894_v48  ;;  %v1893_v50 = vmul.f32 0.044715, %v1891_v18 }
0x174c   :  { %2760 = vtanh.f32 %v1896_v49  ;;  %v1895_v51 = vadd.f32 %v1893_v50, %v1885_v44  ;;  %v2707_v49 = vld [vmem:[%s3433_s22] sm:$0xff]  }
0x174d   :  { %v2350_v50 = vld [vmem:[%s3432_s21] ss:$0 sm:$0xff]  ;;  %s2768_s21 = scalar_lea.vmem %s2234_s12, 32 }
0x174e   :  { %v1897_v52 = vmul.f32 0.7978846, %v1895_v51  ;;  %p2769_p0 = scmp.ne.s32.totalorder %s2234_s12, %s2768_s21  ;;  %p2774_p2 = scmp.lt.s32.totalorder %s2768_s21, %s2768_s21 }
0x1750   :  { %2762 = vtanh.f32 %v1897_v52  ;;  %p2775_p3 = por %p2774_p2, %p2773_p1 }
0x1752   :  { %p2776_p4 = pnand %p2775_p3, %p2769_p0 }
0x1759   :  { %v2761_v54 = vpop.eup %2760 }
0x175a   :  { %v1900_v55 = vadd.f32 1.0, %v2761_v54 }
0x175c   :  { %v1902_v60 = vmul.f32 0.5, %v1900_v55 }
0x175d   :  { %v2763_v59 = vpop.eup %2762 }
0x175e   :  { %v1901_v61 = vadd.f32 1.0, %v2763_v59  ;;  %v1904_v58 = vmul.f32 %v1902_v60, %v1882_v40  ;;  %v2354_v60 = vld [vmem:[%s3434_s23] ss:$0 sm:$0xff] }
0x1760   :  { %v1903_v62 = vmul.f32 0.5, %v1901_v61 }
0x1762   :  { %v1905_v0 = vmul.f32 %v1903_v62, %v1885_v44  ;;  %v2706_v44 = vld [vmem:[%s3433_s22 + $0x8] sm:$0xff]  }
0x1764   :  { %v1915_v53 = vpack.c.bf16 %v1905_v0, %v1904_v58 }
0x1766   :  { %2628 = vmatmul.mubr.msk.bf16.vlgmr.msra.gmra.mxu1 %vm1089_vm10, %v1915_v53 }
0x1767   :  { %2649 = vmatprep.mubr.msk.bf16.mxu1 %vm2792_vm0, %v2791_v6  ;;  %2646 = vmatpush3.bf16.msra.mxu1 %v2706_v44 }
0x1768   :  { %2647 = vmatprep.subr.bf16.mxu1 %v2791_v6 }
0x176b   :  { %2648 = vmatpush3.bf16.msra.mxu1 %v2707_v49 }
0x1826   :  { %v1985_v3 = vpop.f32.mrf.mxu1 }
0x1827   :  { %v1986_v9 = vadd.f32 %v2338_v2, %v1985_v3 }
0x1828   :  { %v2629_v10 = vpop.f32.mrf.mxu1 }
0x1829   :  { %v1992_v11 = vadd.f32 %v1986_v9, %v1816_v33 }
0x182a   :  { %v1988_v13 = vpop.f32.mrf.mxu1 }
0x182b   :  { %v1989_v14 = vadd.f32 %v2338_v2, %v1988_v13  ;;  %v1998_v8 = vsel %vm272_vm8, %v1992_v11, 0.0 }
0x182c   :  { %1999 = vadd.xlane.f32.xlu1 %v1998_v8  ;;  %v2630_v15 = vpop.f32.mrf.mxu1 }
0x182d   :  { %v1993_v56 = vadd.f32 %v1989_v14, %v1817_v7 }
0x182f   :  { %v2001_v1 = vsel %vm272_vm8, %v1993_v56, 0.0 }
0x1830   :  { %2002 = vadd.xlane.f32.xlu0 %v2001_v1 }
0x18b5   :  { %v2000_v19 = vpop.xlane.xlu1 %1999 }
0x18b6   :  { %v2004_v57 = vmul.f32 0.03125, %v2000_v19 }
0x18b8   :  { %v2006_v20 = vsub.f32 %v1992_v11, %v2004_v57 }
0x18b9   :  { %v2003_v21 = vpop.xlane.xlu0 %2002 }
0x18ba   :  { %v2005_v22 = vmul.f32 0.03125, %v2003_v21  ;;  %v2008_v23 = vmul.f32 %v2006_v20, %v2006_v20 }
0x18bc   :  { %v2007_v24 = vsub.f32 %v1993_v56, %v2005_v22  ;;  %v2010_v25 = vsel %vm272_vm8, %v2008_v23, 0.0 }
0x18bd   :  { %2011 = vadd.xlane.f32.xlu1 %v2010_v25 }
0x18be   :  { %v2009_v26 = vmul.f32 %v2007_v24, %v2007_v24 }
0x18c0   :  { %v2013_v27 = vsel %vm272_vm8, %v2009_v26, 0.0 }
0x18c1   :  { %2014 = vadd.xlane.f32.xlu0 %v2013_v27 }
0x1946   :  { %v2012_v30 = vpop.xlane.xlu1 %2011 }
0x1947   :  { %v2016_v28 = vmul.f32 0.03125, %v2012_v30 }
0x1949   :  { %v2018_v4 = vadd.f32 1e-12, %v2016_v28 }
0x194a   :  { %v2015_v29 = vpop.xlane.xlu0 %2014 }
0x194b   :  { %2764 = vrsqrt.f32 %v2018_v4  ;;  %v2017_v31 = vmul.f32 0.03125, %v2015_v29 }
0x194d   :  { %v2019_v5 = vadd.f32 1e-12, %v2017_v31 }
0x194f   :  { %2766 = vrsqrt.f32 %v2019_v5 }
0x1958   :  { %v2765_v33 = vpop.eup %2764 }
0x1959   :  { %v2022_v7 = vmul.f32 %v2765_v33, %v2006_v20 }
0x195b   :  { %v2030_v37 = vmul.f32 %v2346_v34, %v2022_v7 }
0x195c   :  { %v2767_v63 = vpop.eup %2766 }
0x195d   :  { %v2023_v36 = vmul.f32 %v2767_v63, %v2007_v24  ;;  %v2038_v40 = vadd.f32 %v2347_v38, %v2030_v37 }
0x195f   :  { %v2031_v39 = vmul.f32 %v2346_v34, %v2023_v36 }
0x1961   :  { %v2039_v12 = vadd.f32 %v2347_v38, %v2031_v39 }
0x1963   :  { %v2047_v41 = vpack.c.bf16 %v2039_v12, %v2038_v40 }
0x1965   :  { %2632 = vmatpush3.bf16.msra.mxu0 %v2047_v41 }
0x1966   :  { %2637 = vmatprep.subr.bf16.mxu0 %v2791_v6 }
0x1968   :  { %2634 = vmatmul.mubr.msk.bf16.vlgmr.msra.gmra.mxu0 %vm403_vm9, %v2046_v42 }
0x1969   :  { %2638 = vmatpush3.bf16.msra.mxu0 %v2704_v43  ;;  %2641 = vmatprep.mubr.msk.bf16.mxu0 %vm2792_vm0, %v2791_v6 }
0x196a   :  { %2639 = vmatprep.subr.bf16.mxu0 %v2791_v6 }
0x196d   :  { %2640 = vmatpush3.bf16.msra.mxu0 %v2705_v17 }
0x1a28   :  { %v2085_v45 = vpop.f32.mrf.mxu0 }
0x1a29   :  { %v2095_v46 = vpack.c.bf16 %v2085_v45, %v2085_v45 }
0x1a2a   :  { %v2635_v47 = vpop.f32.mrf.mxu0 }
0x1a2b   :  { %2642 = vmatmul.mubr.msk.bf16.vlgmr.msra.gmra.mxu0 %vm272_vm8, %v2095_v46 }
0x1a2c   :  { %v2088_v48 = vpop.f32.mrf.mxu0 }
0x1a2e   :  { %v2636_v18 = vpop.f32.mrf.mxu0 }
0x1aeb   :  { %v2152_v51 = vpop.f32.mrf.mxu0 }
0x1aec   :  { %v2153_v52 = vadd.f32 %v2350_v50, %v2152_v51 }
0x1aed   :  { %v2643_v54 = vpop.f32.mrf.mxu0 }
0x1aee   :  { %v2162_v6 = vpack.c.bf16 %v2153_v52, %v2153_v52 }
0x1aef   :  { %v2155_v55 = vpop.f32.mrf.mxu0 }
0x1af0   :  { %2650 = vmatmul.mubr.msk.bf16.vlgmr.msra.gmra.mxu1 %vm272_vm8, %v2162_v6 }
0x1af1   :  { %v2644_v59 = vpop.f32.mrf.mxu0 }
0x1bb0   :  { %v2219_v61 = vpop.f32.mrf.mxu1 }
0x1bb1   :  { %v2220_v62 = vadd.f32 %v2354_v60, %v2219_v61 }
0x1bb2   :  { %v2651_v58 = vpop.f32.mrf.mxu1 }
0x1bb3   :  { %2226 = vst.msk [vmem:[#allocation2] sm:$0x3] %vm2225_vm12, %v2220_v62 }
0x1bb4   :  { %v2222_v0 = vpop.f32.mrf.mxu1 }
0x1bb5   :  { %2779 = shalt.err (!%p2776_p4)
}
0x1bb6   :  { %2236 = dma.vmem_to_hbm [thread:$0]  %s2234_s12, 32, %s3435_s24, [#allocation3]   ;;  %v2652_v53 = vpop.f32.mrf.mxu1 }
0x1bb7   :  { %2788 = dma.done.wait [#allocation3], 32  }
0x1bb8   :  { %2789 = vsyncadd [#allocation3], 4294967264 }
0x1bb9   :  { %2240 = vsyncpa [#allocation3], 1 }

</bundles_post_ra>
